<compile_context>
chip_gen: v6e
topology: v6e:2x2x1
jax: 0.10.0
libtpu: 0.0.40
codegen_flags: <defaults>
</compile_context>

<pallas_src>
import jax
import jax.numpy as jnp
from jax.experimental import pallas as pl
from jax.experimental.pallas import tpu as pltpu


# --------------------------- kernel 1: stacked projections ---------------------------

def proj_kernel(x_ref, w_ref, b_ref, xc_ref, th_ref, ph_ref, g_ref):
    """[xc | theta | phi | g] = x @ W_big + b_big  (BN + conv chain folded host-side)."""
    C = xc_ref.shape[-1]
    proj = jnp.dot(x_ref[...], w_ref[...], preferred_element_type=jnp.float32)
    proj = proj + b_ref[...]                                  # (tn, 4C)
    xc_ref[...] = proj[:, 0 * C:1 * C]                        # keep xc in f32 (residual path)
    th_ref[...] = proj[:, 1 * C:2 * C].astype(th_ref.dtype)   # bf16 MXU operands
    ph_ref[...] = proj[:, 2 * C:3 * C].astype(ph_ref.dtype)
    g_ref[...] = proj[:, 3 * C:4 * C].astype(g_ref.dtype)


# ------------------------ kernel 2: flash attention + epilogue -----------------------

def attn_kernel(theta_ref, phi_ref, g_ref, xc_ref, x_ref, wa_ref, ba_ref,
                out_ref, m_scr, l_scr, acc_scr):
    ki = pl.program_id(2)

    @pl.when(ki == 0)
    def _init():
        m_scr[...] = jnp.full(m_scr.shape, -jnp.inf, m_scr.dtype)
        l_scr[...] = jnp.zeros(l_scr.shape, l_scr.dtype)
        acc_scr[...] = jnp.zeros(acc_scr.shape, acc_scr.dtype)

    # scores[q, k] = sum_c theta[q, c] * phi[k, c]   (bf16 operands, f32 accumulate)
    s = jax.lax.dot_general(theta_ref[...], phi_ref[...],
                            (((1,), (1,)), ((), ())),
                            preferred_element_type=jnp.float32)        # (tq, tk)

    # online softmax (flash pattern)
    m_prev = m_scr[...]
    m_new = jnp.maximum(m_prev, jnp.max(s, axis=-1, keepdims=True))    # (tq, 1)
    alpha = jnp.exp(m_prev - m_new)
    p = jnp.exp(s - m_new)                                             # (tq, tk) f32
    l_scr[...] = alpha * l_scr[...] + jnp.sum(p, axis=-1, keepdims=True)
    acc_scr[...] = alpha * acc_scr[...] + jnp.dot(
        p.astype(g_ref.dtype), g_ref[...], preferred_element_type=jnp.float32)  # (tq, C)
    m_scr[...] = m_new

    @pl.when(ki == pl.num_programs(2) - 1)
    def _finalize():
        # deferred softmax normalization on the (tq, C) accumulator via approx EUP recip
        attn = acc_scr[...] * pl.reciprocal(l_scr[...], approx=True)
        # attn_conv + attn_bn (folded):  a = attn @ Wa' + ba'
        a = jnp.dot(attn, wa_ref[...], preferred_element_type=jnp.float32) + ba_ref[...]
        out_ref[...] = jnp.maximum(xc_ref[...] + a, 0.0) + x_ref[...]


# ------------------------------------- wrapper ---------------------------------------

@jax.jit
def attention_block(x_nchw, params):
    B, C, H, W = x_nchw.shape
    N = H * W
    eps = 1e-5

    # ---- host-side constant folding (BN into convs; conv -> theta/phi/g chained) ----
    g1, be1, m1, v1 = params['bn1']
    s1 = g1 / jnp.sqrt(v1 + eps)
    wc_f = params['wc'] * s1[:, None]                           # (C, C)
    bc_f = s1 * params['bc'] + (be1 - s1 * m1)                  # (C,)

    def chain(w, b):                                            # proj ∘ (bn ∘ conv)
        return w @ wc_f, w @ bc_f + b

    wt_f, bt_f = chain(params['wt'], params['bt'])
    wp_f, bp_f = chain(params['wp'], params['bp'])
    wg_f, bg_f = chain(params['wg'], params['bg'])

    g2, be2, m2, v2 = params['bn2']
    s2 = g2 / jnp.sqrt(v2 + eps)
    wa_f = params['wa'] * s2[:, None]
    ba_f = s2 * params['ba'] + (be2 - s2 * m2)

    # right-multiplication form for the (N, C) layout: y = x @ W^T + b
    w_big = jnp.concatenate([wc_f.T, wt_f.T, wp_f.T, wg_f.T], axis=1)   # (C, 4C)
    b_big = jnp.concatenate([bc_f, bt_f, bp_f, bg_f])[None, :]          # (1, 4C)
    wa_t = wa_f.T                                                       # (C, C)
    ba_row = ba_f[None, :]                                              # (1, C)

    # NCHW -> (B, N, C): spatial on sublanes, channels on lanes (flash layout)
    x = x_nchw.reshape(B, C, N).transpose(0, 2, 1).astype(jnp.float32)

    tn = tq = tk = 128 if N % 128 == 0 else N                   # sublane tiles

    # -------------------- call 1: projections (once per spatial tile) -----------------
    act_f32 = jax.ShapeDtypeStruct((B, N, C), jnp.float32)
    act_bf16 = jax.ShapeDtypeStruct((B, N, C), jnp.bfloat16)
    proj_spec = pl.BlockSpec((None, tn, C), lambda b, n: (b, n, 0))
    xc, theta, phi, g = pl.pallas_call(
        proj_kernel,
        out_shape=(act_f32, act_bf16, act_bf16, act_bf16),
        grid_spec=pltpu.PrefetchScalarGridSpec(
            num_scalar_prefetch=0,
            grid=(B, N // tn),
            in_specs=[proj_spec,
                      pl.BlockSpec((C, 4 * C), lambda b, n: (0, 0)),
                      pl.BlockSpec((1, 4 * C), lambda b, n: (0, 0))],
            out_specs=(proj_spec, proj_spec, proj_spec, proj_spec)),
        compiler_params=pltpu.CompilerParams(
            dimension_semantics=("parallel", "parallel")),
    )(x, w_big, b_big)

    # ----------------- call 2: flash attention + fused epilogue -----------------------
    n_q, n_k = N // tq, N // tk
    q_spec = pl.BlockSpec((None, tq, C), lambda b, q, k: (b, q, 0))
    kv_spec = pl.BlockSpec((None, tk, C), lambda b, q, k: (b, k, 0))
    cost = pl.CostEstimate(
        flops=int(4 * B * N * N * C + 2 * B * N * C * C),
        transcendentals=int(B * N * N + B * N),
        bytes_accessed=int(3 * B * N * C * 4 + 3 * B * N * C * 2 * n_q))

    out = pl.pallas_call(
        attn_kernel,
        out_shape=jax.ShapeDtypeStruct((B, N, C), jnp.float32),
        grid_spec=pltpu.PrefetchScalarGridSpec(
            num_scalar_prefetch=0,
            grid=(B, n_q, n_k),
            in_specs=[q_spec,                                          # theta
                      kv_spec,                                         # phi
                      kv_spec,                                         # g
                      q_spec,                                          # xc
                      q_spec,                                          # x (residual)
                      pl.BlockSpec((C, C), lambda b, q, k: (0, 0)),    # Wa' (folded)
                      pl.BlockSpec((1, C), lambda b, q, k: (0, 0))],   # ba' (folded)
            out_specs=q_spec,
            scratch_shapes=[pltpu.VMEM((tq, 1), jnp.float32),          # m
                            pltpu.VMEM((tq, 1), jnp.float32),          # l
                            pltpu.VMEM((tq, C), jnp.float32)]),        # acc
        compiler_params=pltpu.CompilerParams(
            dimension_semantics=("parallel", "parallel", "arbitrary"),
            vmem_limit_bytes=32 * 1024 * 1024),
        cost_estimate=cost,
    )(theta, phi, g, xc, x, wa_t, ba_row)

    return out.transpose(0, 2, 1).reshape(B, C, H, W)


# --------------------------------- params / reference --------------------------------

def make_params(key, C):
    ks = jax.random.split(key, 16)

    def conv_w(k):
        return jax.random.normal(k, (C, C), jnp.float32) / jnp.sqrt(jnp.float32(C))

    def conv_b(k):
        return 0.1 * jax.random.normal(k, (C,), jnp.float32)

    def bn(kg, kb):
        gamma = 1.0 + 0.1 * jax.random.normal(kg, (C,), jnp.float32)
        beta = 0.1 * jax.random.normal(kb, (C,), jnp.float32)
        mean = jnp.zeros((C,), jnp.float32)   # eval-mode running stats
        var = jnp.ones((C,), jnp.float32)
        return gamma, beta, mean, var

    return dict(
        wc=conv_w(ks[0]), bc=conv_b(ks[1]), bn1=bn(ks[2], ks[3]),
        wt=conv_w(ks[4]), bt=conv_b(ks[5]),
        wp=conv_w(ks[6]), bp=conv_b(ks[7]),
        wg=conv_w(ks[8]), bg=conv_b(ks[9]),
        wa=conv_w(ks[10]), ba=conv_b(ks[11]), bn2=bn(ks[12], ks[13]))


def reference(x_nchw, params, eps=1e-5):
    """Plain-JAX reference mirroring the PyTorch forward (eval-mode BN), pure f32."""
    B, C, H, W = x_nchw.shape
    N = H * W
    xf = x_nchw.reshape(B, C, N)

    def conv1x1(w, b, z):
        return jnp.einsum('oc,bcn->bon', w, z) + b[None, :, None]

    def bn(p, z):
        gamma, beta, mean, var = p
        s = gamma / jnp.sqrt(var + eps)
        return z * s[None, :, None] + (beta - s * mean)[None, :, None]

    xc = bn(params['bn1'], conv1x1(params['wc'], params['bc'], xf))
    theta = conv1x1(params['wt'], params['bt'], xc)
    phi = conv1x1(params['wp'], params['bp'], xc)
    g = conv1x1(params['wg'], params['bg'], xc)
    scores = jnp.einsum('bcn,bcm->bnm', theta, phi)
    attn = jax.nn.softmax(scores, axis=2)
    attn2 = jnp.einsum('bck,bjk->bcj', g, attn)
    a = bn(params['bn2'], conv1x1(params['wa'], params['ba'], attn2))
    y = jnp.maximum(xc + a, 0.0) + xf
    return y.reshape(B, C, H, W)


if __name__ == "__main__":
    key = jax.random.PRNGKey(0)
    kx, kp = jax.random.split(key)
    # residual add (x + residual) in the module requires in_channels == out_channels
    B, C, H, W = 2, 8, 16, 16
    x = jax.random.normal(kx, (B, C, H, W), jnp.float32)
    params = make_params(kp, C)

    out = attention_block(x, params)
    jax.block_until_ready(out)

    ref = reference(x, params)
    err = float(jnp.max(jnp.abs(out - ref)))
    # bf16 MXU operands + approx-reciprocal softmax normalization -> slightly looser
    # tolerance than the pure-f32 path (which matches at 2e-2).
    assert jnp.allclose(out, ref, rtol=3e-2, atol=3e-2), f"max abs err {err}"
    print("KERNEL_OK")
</pallas_src>

<mosaic_0001>
module attributes {stable_mosaic.version = 11 : i64} {
  func.func @proj_kernel(%arg0: i32, %arg1: i32, %arg2: memref<1x128x8xf32, #tpu.memory_space<vmem>>, %arg3: memref<8x32xf32, #tpu.memory_space<vmem>>, %arg4: memref<1x32xf32, #tpu.memory_space<vmem>>, %arg5: memref<1x128x8xf32, #tpu.memory_space<vmem>>, %arg6: memref<1x128x8xbf16, #tpu.memory_space<vmem>>, %arg7: memref<1x128x8xbf16, #tpu.memory_space<vmem>>, %arg8: memref<1x128x8xbf16, #tpu.memory_space<vmem>>) attributes {dimension_semantics = [#tpu.dimension_semantics<parallel>, #tpu.dimension_semantics<parallel>], iteration_bounds = array<i64: 2, 2>, scalar_prefetch = 0 : i64, scratch_operands = 0 : i64, tpu.core_type = #tpu.core_type<tc>, window_params = [{transform_indices = @transform_0, window_bounds = array<i64: 1, 128, 8>}, {pipeline_mode = #tpu.pipeline_mode<synchronous>, transform_indices = @transform_1, window_bounds = array<i64: 8, 32>}, {pipeline_mode = #tpu.pipeline_mode<synchronous>, transform_indices = @transform_2, window_bounds = array<i64: 1, 32>}, {transform_indices = @transform_3, window_bounds = array<i64: 1, 128, 8>}, {transform_indices = @transform_4, window_bounds = array<i64: 1, 128, 8>}, {transform_indices = @transform_5, window_bounds = array<i64: 1, 128, 8>}, {transform_indices = @transform_6, window_bounds = array<i64: 1, 128, 8>}]} {
    %c0 = arith.constant 0 : index
    %c0_0 = arith.constant 0 : index
    %c0_1 = arith.constant 0 : index
    %0 = vector.load %arg2[%c0, %c0_0, %c0_1] : memref<1x128x8xf32, #tpu.memory_space<vmem>>, vector<1x128x8xf32>
    %1 = vector.shape_cast %0 : vector<1x128x8xf32> to vector<128x8xf32>
    %c0_2 = arith.constant 0 : index
    %c0_3 = arith.constant 0 : index
    %2 = vector.load %arg3[%c0_2, %c0_3] : memref<8x32xf32, #tpu.memory_space<vmem>>, vector<8x32xf32>
    %cst = arith.constant dense<0.000000e+00> : vector<128x32xf32>
    %3 = tpu.matmul %1, %2, %cst {dimension_numbers = #tpu.dot_dimension_numbers<[1], [0], [0], [1], [0, 0, 1, 1], [], []>} : vector<128x8xf32>, vector<8x32xf32>, vector<128x32xf32> -> vector<128x32xf32>
    %c0_4 = arith.constant 0 : index
    %c0_5 = arith.constant 0 : index
    %4 = vector.load %arg4[%c0_4, %c0_5] : memref<1x32xf32, #tpu.memory_space<vmem>>, vector<1x32xf32>
    %5 = vector.broadcast %4 : vector<1x32xf32> to vector<128x32xf32>
    %6 = arith.addf %3, %5 : vector<128x32xf32>
    %7 = vector.extract_strided_slice %6 {offsets = [0, 0], sizes = [128, 8], strides = [1, 1]} : vector<128x32xf32> to vector<128x8xf32>
    %c0_6 = arith.constant 0 : index
    %c0_7 = arith.constant 0 : index
    %c0_8 = arith.constant 0 : index
    %8 = vector.load %arg5[%c0_6, %c0_7, %c0_8] : memref<1x128x8xf32, #tpu.memory_space<vmem>>, vector<1x128x8xf32>
    %9 = vector.shape_cast %8 : vector<1x128x8xf32> to vector<128x8xf32>
    %10 = vector.shape_cast %7 : vector<128x8xf32> to vector<1x128x8xf32>
    tpu.vector_store %arg5[%c0_6, %c0_7, %c0_8], %10 {strides = array<i32>} : memref<1x128x8xf32, #tpu.memory_space<vmem>>, vector<1x128x8xf32>,
    %11 = vector.extract_strided_slice %6 {offsets = [0, 8], sizes = [128, 8], strides = [1, 1]} : vector<128x32xf32> to vector<128x8xf32>
    %12 = arith.truncf %11 : vector<128x8xf32> to vector<128x8xbf16>
    %c0_9 = arith.constant 0 : index
    %c0_10 = arith.constant 0 : index
    %c0_11 = arith.constant 0 : index
    %13 = vector.load %arg6[%c0_9, %c0_10, %c0_11] : memref<1x128x8xbf16, #tpu.memory_space<vmem>>, vector<1x128x8xbf16>
    %14 = vector.shape_cast %13 : vector<1x128x8xbf16> to vector<128x8xbf16>
    %15 = vector.shape_cast %12 : vector<128x8xbf16> to vector<1x128x8xbf16>
    tpu.vector_store %arg6[%c0_9, %c0_10, %c0_11], %15 {strides = array<i32>} : memref<1x128x8xbf16, #tpu.memory_space<vmem>>, vector<1x128x8xbf16>,
    %16 = vector.extract_strided_slice %6 {offsets = [0, 16], sizes = [128, 8], strides = [1, 1]} : vector<128x32xf32> to vector<128x8xf32>
    %17 = arith.truncf %16 : vector<128x8xf32> to vector<128x8xbf16>
    %c0_12 = arith.constant 0 : index
    %c0_13 = arith.constant 0 : index
    %c0_14 = arith.constant 0 : index
    %18 = vector.load %arg7[%c0_12, %c0_13, %c0_14] : memref<1x128x8xbf16, #tpu.memory_space<vmem>>, vector<1x128x8xbf16>
    %19 = vector.shape_cast %18 : vector<1x128x8xbf16> to vector<128x8xbf16>
    %20 = vector.shape_cast %17 : vector<128x8xbf16> to vector<1x128x8xbf16>
    tpu.vector_store %arg7[%c0_12, %c0_13, %c0_14], %20 {strides = array<i32>} : memref<1x128x8xbf16, #tpu.memory_space<vmem>>, vector<1x128x8xbf16>,
    %21 = vector.extract_strided_slice %6 {offsets = [0, 24], sizes = [128, 8], strides = [1, 1]} : vector<128x32xf32> to vector<128x8xf32>
    %22 = arith.truncf %21 : vector<128x8xf32> to vector<128x8xbf16>
    %c0_15 = arith.constant 0 : index
    %c0_16 = arith.constant 0 : index
    %c0_17 = arith.constant 0 : index
    %23 = vector.load %arg8[%c0_15, %c0_16, %c0_17] : memref<1x128x8xbf16, #tpu.memory_space<vmem>>, vector<1x128x8xbf16>
    %24 = vector.shape_cast %23 : vector<1x128x8xbf16> to vector<128x8xbf16>
    %25 = vector.shape_cast %22 : vector<128x8xbf16> to vector<1x128x8xbf16>
    tpu.vector_store %arg8[%c0_15, %c0_16, %c0_17], %25 {strides = array<i32>} : memref<1x128x8xbf16, #tpu.memory_space<vmem>>, vector<1x128x8xbf16>,
    return
  }
  func.func @transform_0(%arg0: i32, %arg1: i32) -> (i32, i32, i32) {
    %c0_i32 = arith.constant 0 : i32
    %c0_i32_0 = arith.constant 0 : i32
    return %arg0, %arg1, %c0_i32 : i32, i32, i32
  }
  func.func @transform_1(%arg0: i32, %arg1: i32) -> (i32, i32) {
    %c0_i32 = arith.constant 0 : i32
    %c0_i32_0 = arith.constant 0 : i32
    %c0_i32_1 = arith.constant 0 : i32
    return %c0_i32, %c0_i32_0 : i32, i32
  }
  func.func @transform_2(%arg0: i32, %arg1: i32) -> (i32, i32) {
    %c0_i32 = arith.constant 0 : i32
    %c0_i32_0 = arith.constant 0 : i32
    %c0_i32_1 = arith.constant 0 : i32
    return %c0_i32, %c0_i32_0 : i32, i32
  }
  func.func @transform_3(%arg0: i32, %arg1: i32) -> (i32, i32, i32) {
    %c0_i32 = arith.constant 0 : i32
    %c0_i32_0 = arith.constant 0 : i32
    return %arg0, %arg1, %c0_i32 : i32, i32, i32
  }
  func.func @transform_4(%arg0: i32, %arg1: i32) -> (i32, i32, i32) {
    %c0_i32 = arith.constant 0 : i32
    %c0_i32_0 = arith.constant 0 : i32
    return %arg0, %arg1, %c0_i32 : i32, i32, i32
  }
  func.func @transform_5(%arg0: i32, %arg1: i32) -> (i32, i32, i32) {
    %c0_i32 = arith.constant 0 : i32
    %c0_i32_0 = arith.constant 0 : i32
    return %arg0, %arg1, %c0_i32 : i32, i32, i32
  }
  func.func @transform_6(%arg0: i32, %arg1: i32) -> (i32, i32, i32) {
    %c0_i32 = arith.constant 0 : i32
    %c0_i32_0 = arith.constant 0 : i32
    return %arg0, %arg1, %c0_i32 : i32, i32, i32
  }
}

module attributes {stable_mosaic.version = 11 : i64} {
  func.func @attn_kernel(%arg0: i32, %arg1: i32, %arg2: i32, %arg3: memref<1x128x8xbf16, #tpu.memory_space<vmem>>, %arg4: memref<1x128x8xbf16, #tpu.memory_space<vmem>>, %arg5: memref<1x128x8xbf16, #tpu.memory_space<vmem>>, %arg6: memref<1x128x8xf32, #tpu.memory_space<vmem>>, %arg7: memref<1x128x8xf32, #tpu.memory_space<vmem>>, %arg8: memref<8x8xf32, #tpu.memory_space<vmem>>, %arg9: memref<1x8xf32, #tpu.memory_space<vmem>>, %arg10: memref<1x128x8xf32, #tpu.memory_space<vmem>>, %arg11: memref<128x1xf32, #tpu.memory_space<vmem>>, %arg12: memref<128x1xf32, #tpu.memory_space<vmem>>, %arg13: memref<128x8xf32, #tpu.memory_space<vmem>>) attributes {dimension_semantics = [#tpu.dimension_semantics<parallel>, #tpu.dimension_semantics<parallel>, #tpu.dimension_semantics<arbitrary>], iteration_bounds = array<i64: 2, 2, 2>, scalar_prefetch = 0 : i64, scratch_operands = 3 : i64, tpu.core_type = #tpu.core_type<tc>, window_params = [{transform_indices = @transform_0, window_bounds = array<i64: 1, 128, 8>}, {transform_indices = @transform_1, window_bounds = array<i64: 1, 128, 8>}, {transform_indices = @transform_2, window_bounds = array<i64: 1, 128, 8>}, {transform_indices = @transform_3, window_bounds = array<i64: 1, 128, 8>}, {transform_indices = @transform_4, window_bounds = array<i64: 1, 128, 8>}, {pipeline_mode = #tpu.pipeline_mode<synchronous>, transform_indices = @transform_5, window_bounds = array<i64: 8, 8>}, {pipeline_mode = #tpu.pipeline_mode<synchronous>, transform_indices = @transform_6, window_bounds = array<i64: 1, 8>}, {transform_indices = @transform_7, window_bounds = array<i64: 1, 128, 8>}]} {
    %c0_i32 = arith.constant 0 : i32
    %0 = arith.cmpi eq, %arg2, %c0_i32 : i32
    %1 = arith.extui %0 : i1 to i32
    %c0_i32_0 = arith.constant 0 : i32
    %2 = arith.cmpi ne, %1, %c0_i32_0 : i32
    scf.if %2 {
      %cst_25 = arith.constant 0xFF800000 : f32
      %36 = vector.broadcast %cst_25 : f32 to vector<128x1xf32>
      %c0_26 = arith.constant 0 : index
      %c0_27 = arith.constant 0 : index
      %37 = vector.load %arg11[%c0_26, %c0_27] : memref<128x1xf32, #tpu.memory_space<vmem>>, vector<128x1xf32>
      tpu.vector_store %arg11[%c0_26, %c0_27], %36 {strides = array<i32>} : memref<128x1xf32, #tpu.memory_space<vmem>>, vector<128x1xf32>,
      %cst_28 = arith.constant 0.000000e+00 : f32
      %38 = vector.broadcast %cst_28 : f32 to vector<128x1xf32>
      %c0_29 = arith.constant 0 : index
      %c0_30 = arith.constant 0 : index
      %39 = vector.load %arg12[%c0_29, %c0_30] : memref<128x1xf32, #tpu.memory_space<vmem>>, vector<128x1xf32>
      tpu.vector_store %arg12[%c0_29, %c0_30], %38 {strides = array<i32>} : memref<128x1xf32, #tpu.memory_space<vmem>>, vector<128x1xf32>,
      %cst_31 = arith.constant 0.000000e+00 : f32
      %40 = vector.broadcast %cst_31 : f32 to vector<128x8xf32>
      %c0_32 = arith.constant 0 : index
      %c0_33 = arith.constant 0 : index
      %41 = vector.load %arg13[%c0_32, %c0_33] : memref<128x8xf32, #tpu.memory_space<vmem>>, vector<128x8xf32>
      tpu.vector_store %arg13[%c0_32, %c0_33], %40 {strides = array<i32>} : memref<128x8xf32, #tpu.memory_space<vmem>>, vector<128x8xf32>,
    } else {
    }
    %c0 = arith.constant 0 : index
    %c0_1 = arith.constant 0 : index
    %c0_2 = arith.constant 0 : index
    %3 = vector.load %arg3[%c0, %c0_1, %c0_2] : memref<1x128x8xbf16, #tpu.memory_space<vmem>>, vector<1x128x8xbf16>
    %4 = vector.shape_cast %3 : vector<1x128x8xbf16> to vector<128x8xbf16>
    %c0_3 = arith.constant 0 : index
    %c0_4 = arith.constant 0 : index
    %c0_5 = arith.constant 0 : index
    %5 = vector.load %arg4[%c0_3, %c0_4, %c0_5] : memref<1x128x8xbf16, #tpu.memory_space<vmem>>, vector<1x128x8xbf16>
    %6 = vector.shape_cast %5 : vector<1x128x8xbf16> to vector<128x8xbf16>
    %cst = arith.constant dense<0.000000e+00> : vector<128x128xf32>
    %7 = tpu.matmul %4, %6, %cst {dimension_numbers = #tpu.dot_dimension_numbers<[1], [1], [0], [0], [0, 0, 1, 0], [], []>} : vector<128x8xbf16>, vector<128x8xbf16>, vector<128x128xf32> -> vector<128x128xf32>
    %c0_6 = arith.constant 0 : index
    %c0_7 = arith.constant 0 : index
    %8 = vector.load %arg11[%c0_6, %c0_7] : memref<128x1xf32, #tpu.memory_space<vmem>>, vector<128x1xf32>
    %cst_8 = arith.constant dense<0xFF800000> : vector<128xf32>
    %9 = vector.multi_reduction <maximumf>, %7, %cst_8 [1] : vector<128x128xf32> to vector<128xf32>
    %10 = vector.shape_cast %9 : vector<128xf32> to vector<128x1xf32>
    %11 = arith.maximumf %8, %10 : vector<128x1xf32>
    %12 = arith.subf %8, %11 : vector<128x1xf32>
    %13 = math.exp %12 : vector<128x1xf32>
    %14 = vector.broadcast %11 : vector<128x1xf32> to vector<128x128xf32>
    %15 = arith.subf %7, %14 : vector<128x128xf32>
    %16 = math.exp %15 : vector<128x128xf32>
    %c0_9 = arith.constant 0 : index
    %c0_10 = arith.constant 0 : index
    %17 = vector.load %arg12[%c0_9, %c0_10] : memref<128x1xf32, #tpu.memory_space<vmem>>, vector<128x1xf32>
    %18 = arith.mulf %13, %17 : vector<128x1xf32>
    %cst_11 = arith.constant dense<0.000000e+00> : vector<128xf32>
    %19 = vector.multi_reduction <add>, %16, %cst_11 [1] : vector<128x128xf32> to vector<128xf32>
    %20 = vector.shape_cast %19 : vector<128xf32> to vector<128x1xf32>
    %21 = arith.addf %18, %20 : vector<128x1xf32>
    %c0_12 = arith.constant 0 : index
    %c0_13 = arith.constant 0 : index
    %22 = vector.load %arg12[%c0_12, %c0_13] : memref<128x1xf32, #tpu.memory_space<vmem>>, vector<128x1xf32>
    tpu.vector_store %arg12[%c0_12, %c0_13], %21 {strides = array<i32>} : memref<128x1xf32, #tpu.memory_space<vmem>>, vector<128x1xf32>,
    %c0_14 = arith.constant 0 : index
    %c0_15 = arith.constant 0 : index
    %23 = vector.load %arg13[%c0_14, %c0_15] : memref<128x8xf32, #tpu.memory_space<vmem>>, vector<128x8xf32>
    %24 = vector.broadcast %13 : vector<128x1xf32> to vector<128x8xf32>
    %25 = arith.mulf %24, %23 : vector<128x8xf32>
    %26 = arith.truncf %16 : vector<128x128xf32> to vector<128x128xbf16>
    %c0_16 = arith.constant 0 : index
    %c0_17 = arith.constant 0 : index
    %c0_18 = arith.constant 0 : index
    %27 = vector.load %arg5[%c0_16, %c0_17, %c0_18] : memref<1x128x8xbf16, #tpu.memory_space<vmem>>, vector<1x128x8xbf16>
    %28 = vector.shape_cast %27 : vector<1x128x8xbf16> to vector<128x8xbf16>
    %cst_19 = arith.constant dense<0.000000e+00> : vector<128x8xf32>
    %29 = tpu.matmul %26, %28, %cst_19 {dimension_numbers = #tpu.dot_dimension_numbers<[1], [0], [0], [1], [0, 0, 1, 1], [], []>} : vector<128x128xbf16>, vector<128x8xbf16>, vector<128x8xf32> -> vector<128x8xf32>
    %30 = arith.addf %25, %29 : vector<128x8xf32>
    %c0_20 = arith.constant 0 : index
    %c0_21 = arith.constant 0 : index
    %31 = vector.load %arg13[%c0_20, %c0_21] : memref<128x8xf32, #tpu.memory_space<vmem>>, vector<128x8xf32>
    tpu.vector_store %arg13[%c0_20, %c0_21], %30 {strides = array<i32>} : memref<128x8xf32, #tpu.memory_space<vmem>>, vector<128x8xf32>,
    %c0_22 = arith.constant 0 : index
    %c0_23 = arith.constant 0 : index
    %32 = vector.load %arg11[%c0_22, %c0_23] : memref<128x1xf32, #tpu.memory_space<vmem>>, vector<128x1xf32>
    tpu.vector_store %arg11[%c0_22, %c0_23], %11 {strides = array<i32>} : memref<128x1xf32, #tpu.memory_space<vmem>>, vector<128x1xf32>,
    %c1_i32 = arith.constant 1 : i32
    %33 = arith.cmpi eq, %arg2, %c1_i32 : i32
    %34 = arith.extui %33 : i1 to i32
    %c0_i32_24 = arith.constant 0 : i32
    %35 = arith.cmpi ne, %34, %c0_i32_24 : i32
    scf.if %35 {
      %c0_25 = arith.constant 0 : index
      %c0_26 = arith.constant 0 : index
      %36 = vector.load %arg13[%c0_25, %c0_26] : memref<128x8xf32, #tpu.memory_space<vmem>>, vector<128x8xf32>
      %c0_27 = arith.constant 0 : index
      %c0_28 = arith.constant 0 : index
      %37 = vector.load %arg12[%c0_27, %c0_28] : memref<128x1xf32, #tpu.memory_space<vmem>>, vector<128x1xf32>
      %38 = tpu.reciprocal %37 {approx = true} : vector<128x1xf32> -> vector<128x1xf32>
      %39 = vector.broadcast %38 : vector<128x1xf32> to vector<128x8xf32>
      %40 = arith.mulf %36, %39 : vector<128x8xf32>
      %c0_29 = arith.constant 0 : index
      %c0_30 = arith.constant 0 : index
      %41 = vector.load %arg8[%c0_29, %c0_30] : memref<8x8xf32, #tpu.memory_space<vmem>>, vector<8x8xf32>
      %cst_31 = arith.constant dense<0.000000e+00> : vector<128x8xf32>
      %42 = tpu.matmul %40, %41, %cst_31 {dimension_numbers = #tpu.dot_dimension_numbers<[1], [0], [0], [1], [0, 0, 1, 1], [], []>} : vector<128x8xf32>, vector<8x8xf32>, vector<128x8xf32> -> vector<128x8xf32>
      %c0_32 = arith.constant 0 : index
      %c0_33 = arith.constant 0 : index
      %43 = vector.load %arg9[%c0_32, %c0_33] : memref<1x8xf32, #tpu.memory_space<vmem>>, vector<1x8xf32>
      %44 = vector.broadcast %43 : vector<1x8xf32> to vector<128x8xf32>
      %45 = arith.addf %42, %44 : vector<128x8xf32>
      %c0_34 = arith.constant 0 : index
      %c0_35 = arith.constant 0 : index
      %c0_36 = arith.constant 0 : index
      %46 = vector.load %arg6[%c0_34, %c0_35, %c0_36] : memref<1x128x8xf32, #tpu.memory_space<vmem>>, vector<1x128x8xf32>
      %47 = vector.shape_cast %46 : vector<1x128x8xf32> to vector<128x8xf32>
      %48 = arith.addf %47, %45 : vector<128x8xf32>
      %cst_37 = arith.constant 0.000000e+00 : f32
      %49 = vector.broadcast %cst_37 : f32 to vector<128x8xf32>
      %50 = arith.maximumf %48, %49 : vector<128x8xf32>
      %c0_38 = arith.constant 0 : index
      %c0_39 = arith.constant 0 : index
      %c0_40 = arith.constant 0 : index
      %51 = vector.load %arg7[%c0_38, %c0_39, %c0_40] : memref<1x128x8xf32, #tpu.memory_space<vmem>>, vector<1x128x8xf32>
      %52 = vector.shape_cast %51 : vector<1x128x8xf32> to vector<128x8xf32>
      %53 = arith.addf %50, %52 : vector<128x8xf32>
      %c0_41 = arith.constant 0 : index
      %c0_42 = arith.constant 0 : index
      %c0_43 = arith.constant 0 : index
      %54 = vector.load %arg10[%c0_41, %c0_42, %c0_43] : memref<1x128x8xf32, #tpu.memory_space<vmem>>, vector<1x128x8xf32>
      %55 = vector.shape_cast %54 : vector<1x128x8xf32> to vector<128x8xf32>
      %56 = vector.shape_cast %53 : vector<128x8xf32> to vector<1x128x8xf32>
      tpu.vector_store %arg10[%c0_41, %c0_42, %c0_43], %56 {strides = array<i32>} : memref<1x128x8xf32, #tpu.memory_space<vmem>>, vector<1x128x8xf32>,
    } else {
    }
    return
  }
  func.func @transform_0(%arg0: i32, %arg1: i32, %arg2: i32) -> (i32, i32, i32) {
    %c0_i32 = arith.constant 0 : i32
    %c0_i32_0 = arith.constant 0 : i32
    return %arg0, %arg1, %c0_i32 : i32, i32, i32
  }
  func.func @transform_1(%arg0: i32, %arg1: i32, %arg2: i32) -> (i32, i32, i32) {
    %c0_i32 = arith.constant 0 : i32
    %c0_i32_0 = arith.constant 0 : i32
    return %arg0, %arg2, %c0_i32 : i32, i32, i32
  }
  func.func @transform_2(%arg0: i32, %arg1: i32, %arg2: i32) -> (i32, i32, i32) {
    %c0_i32 = arith.constant 0 : i32
    %c0_i32_0 = arith.constant 0 : i32
    return %arg0, %arg2, %c0_i32 : i32, i32, i32
  }
  func.func @transform_3(%arg0: i32, %arg1: i32, %arg2: i32) -> (i32, i32, i32) {
    %c0_i32 = arith.constant 0 : i32
    %c0_i32_0 = arith.constant 0 : i32
    return %arg0, %arg1, %c0_i32 : i32, i32, i32
  }
  func.func @transform_4(%arg0: i32, %arg1: i32, %arg2: i32) -> (i32, i32, i32) {
    %c0_i32 = arith.constant 0 : i32
    %c0_i32_0 = arith.constant 0 : i32
    return %arg0, %arg1, %c0_i32 : i32, i32, i32
  }
  func.func @transform_5(%arg0: i32, %arg1: i32, %arg2: i32) -> (i32, i32) {
    %c0_i32 = arith.constant 0 : i32
    %c0_i32_0 = arith.constant 0 : i32
    %c0_i32_1 = arith.constant 0 : i32
    return %c0_i32, %c0_i32_0 : i32, i32
  }
  func.func @transform_6(%arg0: i32, %arg1: i32, %arg2: i32) -> (i32, i32) {
    %c0_i32 = arith.constant 0 : i32
    %c0_i32_0 = arith.constant 0 : i32
    %c0_i32_1 = arith.constant 0 : i32
    return %c0_i32, %c0_i32_0 : i32, i32
  }
  func.func @transform_7(%arg0: i32, %arg1: i32, %arg2: i32) -> (i32, i32, i32) {
    %c0_i32 = arith.constant 0 : i32
    %c0_i32_0 = arith.constant 0 : i32
    return %arg0, %arg1, %c0_i32 : i32, i32, i32
  }
}

</mosaic_0001>

<bundles_post_ra>
// kernel: attention_block.2
= control target key start
LH: loop header
LB: loop body
LE: loop exit
PB: predicated region body
PF: predicated region fallthrough
CT: control target
= control target key end

     0   :  { %s1313_s21 = smov 0   ;;  %s1315_s22 = smov 0   ;;  %s1587_s0 = inlined_call_operand.vmem [shape: f32[2,256,8], index: 0, kind: input, shape index: {}]   ;;  %s1588_s1 = inlined_call_operand.vmem [shape: f32[8,32], index: 1, kind: input, shape index: {}]   ;;  %s1589_s2 = inlined_call_operand.vmem [shape: f32[1,32], index: 2, kind: input, shape index: {}]   ;;  %s1590_s3 = inlined_call_operand.vmem [shape: f32[2,256,8], index: 3, kind: output, shape index: {0}]   ;;  %s1591_s4 = inlined_call_operand.vmem [shape: bf16[2,256,8], index: 4, kind: output, shape index: {1}]   ;;  %s1592_s5 = inlined_call_operand.vmem [shape: bf16[2,256,8], index: 5, kind: output, shape index: {2}]   ;;  %s1593_s6 = inlined_call_operand.vmem [shape: bf16[2,256,8], index: 6, kind: output, shape index: {3}]  }
   0x1   :  { %s1317_s23 = smov 0   ;;  %s1319_s24 = smov 0  }
   0x2   :  { %s1321_s25 = smov 0  }
   0x3 LB: > { %s26_s26 = sadd.s32 1, %s1265_s23  ;;  %s29_s27 = sadd.s32 1, %s1269_s24  ;;  %s1273_s25 = sphi %s1321_s25, %s17_s25   ;;  %s1269_s24 = sphi %s1319_s24, %s1597_s24   ;;  %s1265_s23 = sphi %s1317_s23, %s1596_s23   ;;  %s1261_s22 = sphi %s1315_s22, %s1595_s22   ;;  %s1257_s21 = sphi %s1313_s21, %s1594_s21  }
   0x4   : > { %p27_p0 = scmp.ge.s32.totalorder %s26_s26, 2  ;;  %p1080_p1 = scmp.ge.s32.totalorder %s1273_s25, 1 }
   0x5   : > { %p246_p2 = scmp.lt.s32.totalorder %s1273_s25, 5 }
   0x6   : > { %s1599_s26 = smov (%p27_p0, %s26_s26), 0  ;;  %s1601_s27 = smov (!%p27_p0, %s29_s27), %s1269_s24 }
   0x7   : > { %p247_p3 = pnand %p1080_p1, %p246_p2  ;;  %p31_p4 = scmp.ge.s32.totalorder %s1601_s27, 2 }
   0x8   : > { %s1081_s30 = sshll.u32 (!%p247_p3), %s1257_s21, 4  ;;  %p312_p5 = scmp.lt.s32.totalorder (!%p247_p3), %s1261_s22, 1 }
   0x9   : > { %s1603_s27 = smov (%p31_p4, %s1601_s27), 0  ;;  %250 = sbr.rel (%p247_p3) target bundleno = 427 (0x1ab), region = 32 }
   0xa   : > { %p314_p6 = scmp.lt.s32.totalorder (!%p247_p3), %s1081_s30, 31  ;;  %s1275_s18 = smov (!%p247_p3), 120  }
   0xb   : > { %s1276_s19 = smov (!%p247_p3), 112   ;;  %s1277_s20 = smov (!%p247_p3), 104  }
   0xe   : > { %v377_v0 = vld [vmem:[%s1588_s1] sm:$0xff]  ;;  %s1605_s22 = smov (!%p312_p5, %s1261_s22), 1  ;;  %s1607_s30 = smov (!%p314_p6, %s1081_s30), 31  ;;  %vm385_vm0 = vcmask 64512   ;;  %vm691_vm1 = vcmask 60416  }
   0xf   : > { %1164 = vmatprep.subr.mxu0 %v377_v0  ;;  %1190 = vmatprep.subr.mxu1 %v377_v0  ;;  %s1082_s7 = sshll.u32 %s1605_s22, 5  ;;  %v1096_v17 = vld [vmem:[%s1589_s2] ss:$0 sm:$0xff] }
  0x10   : > { %1165 = vmatpush3.msra.mxu0 %v377_v0  ;;  %1191 = vmatpush3.msra.mxu1 %v377_v0  ;;  %s1346_s8 = sadd.s32 %s1082_s7, %s1607_s30 }
  0x11   : > { %s1083_s9 = sshll.u32 %s1346_s8, 3  ;;  %s1089_s21 = sshll.u32 %s1346_s8, 2 }
  0x12   : > { %s319_s12 = scalar_lea.vmem %s1587_s0, %s1083_s9  ;;  %s1378_s17 = scalar_lea.vmem %s1590_s3, %s1083_s9 }
  0x13   : > { %v361_v1 = vld [vmem:[%s319_s12] sm:$0xff]  ;;  %v362_v3 = vld [vmem:[%s319_s12 + $0x8] sm:$0xff]  ;;  %v363_v5 = vld [vmem:[%s319_s12 + $0x10] sm:$0xff]  ;;  %s1464_s29 = scalar_lea.vmem %s1591_s4, %s1089_s21  ;;  %s1473_s8 = scalar_lea.vmem %s1592_s5, %s1089_s21 }
  0x14   : > { %v369_v2 = vld [vmem:[%s319_s12 + $0x40] sm:$0xff]  ;;  %1166 = vmatprep.mubr.msk.f32.mxu0 %vm385_vm0, %v361_v1  ;;  %v370_v4 = vld [vmem:[%s319_s12 + $0x48] sm:$0xff]  ;;  %v371_v6 = vld [vmem:[%s319_s12 + $0x50] sm:$0xff]  ;;  %s1486_s11 = scalar_lea.vmem %s1593_s6, %s1089_s21 }
  0x15   : > { %1178 = vmatprep.mubr.msk.f32.mxu1 %vm385_vm0, %v369_v2  ;;  %1167 = vmatmul.mubr.msk.f32.vlgmr.msra.gmra.mxu0 %vm385_vm0, %v362_v3  ;;  %v364_v7 = vld [vmem:[%s319_s12 + $0x18] sm:$0xff]  ;;  %v365_v9 = vld [vmem:[%s319_s12 + $0x20] sm:$0xff]  ;;  %v366_v11 = vld [vmem:[%s319_s12 + $0x28] sm:$0xff] }
  0x16   : > { %1179 = vmatmul.mubr.msk.f32.vlgmr.msra.gmra.mxu1 %vm385_vm0, %v370_v4  ;;  %1169 = vmatprep.mubr.msk.f32.mxu0 %vm385_vm0, %v363_v5  ;;  %v372_v8 = vld [vmem:[%s319_s12 + $0x58] sm:$0xff]  ;;  %v373_v10 = vld [vmem:[%s319_s12 + $0x60] sm:$0xff]  ;;  %v374_v12 = vld [vmem:[%s319_s12 + $0x68] sm:$0xff] }
  0x17   : > { %1181 = vmatprep.mubr.msk.f32.mxu1 %vm385_vm0, %v371_v6  ;;  %v367_v13 = vld [vmem:[%s319_s12 + $0x30] sm:$0xff]  ;;  %v368_v15 = vld [vmem:[%s319_s12 + $0x38] sm:$0xff] }
  0x18   : > { %v375_v14 = vld [vmem:[%s319_s12 + $0x70] sm:$0xff]  ;;  %v376_v16 = vld [vmem:[%s319_s12 + $0x78] sm:$0xff] }
  0x19   : > { %1170 = vmatmul.mubr.msk.f32.gmra.mxu0 %vm385_vm0, %v364_v7 }
  0x1a   : > { %1182 = vmatmul.mubr.msk.f32.gmra.mxu1 %vm385_vm0, %v372_v8  ;;  %1172 = vmatprep.mubr.msk.f32.mxu0 %vm385_vm0, %v365_v9 }
  0x1b   : > { %1184 = vmatprep.mubr.msk.f32.mxu1 %vm385_vm0, %v373_v10 }
  0x1d   : > { %1173 = vmatmul.mubr.msk.f32.gmra.mxu0 %vm385_vm0, %v366_v11 }
  0x1e   : > { %1185 = vmatmul.mubr.msk.f32.gmra.mxu1 %vm385_vm0, %v374_v12  ;;  %1175 = vmatprep.mubr.msk.f32.mxu0 %vm385_vm0, %v367_v13 }
  0x1f   : > { %1187 = vmatprep.mubr.msk.f32.mxu1 %vm385_vm0, %v375_v14 }
  0x21   : > { %1176 = vmatmul.mubr.msk.f32.gmra.mxu0 %vm385_vm0, %v368_v15 }
  0x22   : > { %1188 = vmatmul.mubr.msk.f32.gmra.mxu1 %vm385_vm0, %v376_v16 }
  0xd5   : > { %v1168_v18 = vpop.f32.mrf.mxu0 }
  0xd6   : > { %v1180_v19 = vpop.f32.mrf.mxu1  ;;  %v506_v20 = vadd.f32 %v1168_v18, %v1096_v17 }
  0xd7   : > { %v546_v21 = vadd.f32 %v1180_v19, %v1096_v17  ;;  %v500_v22 = vpop.f32.mrf.mxu0 }
  0xd8   : > { %v540_v23 = vpop.f32.mrf.mxu1  ;;  %580 = vst.msk [vmem:[%s1378_s17 + $0x8] sm:$0xff] %vm385_vm0, %v506_v20  ;;  %v1132_v24 = vpack.c.bf16 %v506_v20, %v506_v20  ;;  %v501_v26 = vadd.f32 %v1096_v17, %v500_v22 }
  0xd9   : > { %588 = vst.msk [vmem:[%s1378_s17 + $0x48] sm:$0xff] %vm385_vm0, %v546_v21  ;;  %v1140_v25 = vpack.c.bf16 %v546_v21, %v546_v21  ;;  %v541_v27 = vadd.f32 %v1096_v17, %v540_v23  ;;  %v1171_v28 = vpop.f32.mrf.mxu0 }
  0xda   : > { %v1183_v29 = vpop.f32.mrf.mxu1  ;;  %579 = vst.msk [vmem:[%s1378_s17] sm:$0xff] %vm385_vm0, %v501_v26  ;;  %645 = vrot.lane.b32.xlu0 %v1132_v24, %s1275_s18  ;;  %v516_v30 = vadd.f32 %v1171_v28, %v1096_v17  ;;  %v1131_v34 = vpack.c.bf16 %v501_v26, %v501_v26 }
  0xdb   : > { %587 = vst.msk [vmem:[%s1378_s17 + $0x40] sm:$0xff] %vm385_vm0, %v541_v27  ;;  %661 = vrot.lane.b32.xlu1 %v1140_v25, %s1275_s18  ;;  %v510_v31 = vpop.f32.mrf.mxu0  ;;  %v556_v32 = vadd.f32 %v1183_v29, %v1096_v17  ;;  %v1139_v43 = vpack.c.bf16 %v541_v27, %v541_v27 }
  0xdc   : > { %v550_v33 = vpop.f32.mrf.mxu1  ;;  %582 = vst.msk [vmem:[%s1378_s17 + $0x18] sm:$0xff] %vm385_vm0, %v516_v30  ;;  %v511_v35 = vadd.f32 %v1096_v17, %v510_v31  ;;  %v1134_v54 = vpack.c.bf16 %v516_v30, %v516_v30 }
  0xdd   : > { %v551_v36 = vadd.f32 %v1096_v17, %v550_v33  ;;  %590 = vst.msk [vmem:[%s1378_s17 + $0x58] sm:$0xff] %vm385_vm0, %v556_v32  ;;  %v1174_v37 = vpop.f32.mrf.mxu0  ;;  %v1142_v55 = vpack.c.bf16 %v556_v32, %v556_v32 }
  0xde   : > { %v1186_v38 = vpop.f32.mrf.mxu1  ;;  %643 = vrot.lane.b32.xlu0 %v1131_v34, %s1275_s18  ;;  %581 = vst.msk [vmem:[%s1378_s17 + $0x10] sm:$0xff] %vm385_vm0, %v511_v35  ;;  %v526_v39 = vadd.f32 %v1174_v37, %v1096_v17  ;;  %v1133_v57 = vpack.c.bf16 %v511_v35, %v511_v35 }
  0xdf   : > { %710 = vrot.lane.b32.xlu1 %v1132_v24, %s1276_s19  ;;  %589 = vst.msk [vmem:[%s1378_s17 + $0x50] sm:$0xff] %vm385_vm0, %v551_v36  ;;  %v520_v40 = vpop.f32.mrf.mxu0  ;;  %v566_v41 = vadd.f32 %v1186_v38, %v1096_v17  ;;  %v1141_v56 = vpack.c.bf16 %v551_v36, %v551_v36 }
  0xe0   : > { %v560_v42 = vpop.f32.mrf.mxu1  ;;  %584 = vst.msk [vmem:[%s1378_s17 + $0x28] sm:$0xff] %vm385_vm0, %v526_v39  ;;  %v521_v44 = vadd.f32 %v1096_v17, %v520_v40  ;;  %v1136_v58 = vpack.c.bf16 %v526_v39, %v526_v39 }
  0xe1   : > { %v561_v45 = vadd.f32 %v1096_v17, %v560_v42  ;;  %592 = vst.msk [vmem:[%s1378_s17 + $0x68] sm:$0xff] %vm385_vm0, %v566_v41  ;;  %v1177_v46 = vpop.f32.mrf.mxu0  ;;  %v1144_v60 = vpack.c.bf16 %v566_v41, %v566_v41 }
  0xe2   : > { %v1189_v47 = vpop.f32.mrf.mxu1  ;;  %659 = vrot.lane.b32.xlu0 %v1139_v43, %s1275_s18  ;;  %583 = vst.msk [vmem:[%s1378_s17 + $0x20] sm:$0xff] %vm385_vm0, %v521_v44  ;;  %v536_v48 = vadd.f32 %v1177_v46, %v1096_v17  ;;  %v1135_v59 = vpack.c.bf16 %v521_v44, %v521_v44 }
  0xe3   : > { %726 = vrot.lane.b32.xlu1 %v1140_v25, %s1276_s19  ;;  %591 = vst.msk [vmem:[%s1378_s17 + $0x60] sm:$0xff] %vm385_vm0, %v561_v45  ;;  %v530_v49 = vpop.f32.mrf.mxu0  ;;  %v576_v50 = vadd.f32 %v1189_v47, %v1096_v17  ;;  %v1143_v61 = vpack.c.bf16 %v561_v45, %v561_v45 }
  0xe4   : > { %v570_v51 = vpop.f32.mrf.mxu1  ;;  %586 = vst.msk [vmem:[%s1378_s17 + $0x38] sm:$0xff] %vm385_vm0, %v536_v48  ;;  %v531_v52 = vadd.f32 %v1096_v17, %v530_v49  ;;  %v1138_v62 = vpack.c.bf16 %v536_v48, %v536_v48 }
  0xe5   : > { %v571_v53 = vadd.f32 %v1096_v17, %v570_v51  ;;  %594 = vst.msk [vmem:[%s1378_s17 + $0x78] sm:$0xff] %vm385_vm0, %v576_v50  ;;  %v1146_v0 = vpack.c.bf16 %v576_v50, %v576_v50 }
  0xe6   : > { %708 = vrot.lane.b32.xlu0 %v1131_v34, %s1276_s19  ;;  %585 = vst.msk [vmem:[%s1378_s17 + $0x30] sm:$0xff] %vm385_vm0, %v531_v52  ;;  %v1137_v63 = vpack.c.bf16 %v531_v52, %v531_v52 }
  0xe7   : > { %774 = vrot.lane.b32.xlu1 %v1132_v24, %s1277_s20  ;;  %593 = vst.msk [vmem:[%s1378_s17 + $0x70] sm:$0xff] %vm385_vm0, %v571_v53  ;;  %v1145_v1 = vpack.c.bf16 %v571_v53, %v571_v53 }
  0xea   : > { %724 = vrot.lane.b32.xlu0 %v1139_v43, %s1276_s19 }
  0xeb   : > { %790 = vrot.lane.b32.xlu1 %v1140_v25, %s1277_s20 }
  0xee   : > { %772 = vrot.lane.b32.xlu0 %v1131_v34, %s1277_s20 }
  0xef   : > { %649 = vrot.lane.b32.xlu1 %v1134_v54, %s1275_s18 }
  0xf2   : > { %788 = vrot.lane.b32.xlu0 %v1139_v43, %s1277_s20 }
  0xf3   : > { %665 = vrot.lane.b32.xlu1 %v1142_v55, %s1275_s18 }
  0xf6   : > { %663 = vrot.lane.b32.xlu0 %v1141_v56, %s1275_s18 }
  0xf7   : > { %714 = vrot.lane.b32.xlu1 %v1134_v54, %s1276_s19 }
  0xfa   : > { %712 = vrot.lane.b32.xlu0 %v1133_v57, %s1276_s19 }
  0xfb   : > { %730 = vrot.lane.b32.xlu1 %v1142_v55, %s1276_s19 }
  0xfe   : > { %728 = vrot.lane.b32.xlu0 %v1141_v56, %s1276_s19 }
  0xff   : > { %778 = vrot.lane.b32.xlu1 %v1134_v54, %s1277_s20 }
 0x102   : > { %776 = vrot.lane.b32.xlu0 %v1133_v57, %s1277_s20 }
 0x103   : > { %794 = vrot.lane.b32.xlu1 %v1142_v55, %s1277_s20 }
 0x106   : > { %792 = vrot.lane.b32.xlu0 %v1141_v56, %s1277_s20 }
 0x107   : > { %647 = vrot.lane.b32.xlu1 %v1133_v57, %s1275_s18 }
 0x10a   : > { %651 = vrot.lane.b32.xlu0 %v1135_v59, %s1275_s18 }
 0x10b   : > { %653 = vrot.lane.b32.xlu1 %v1136_v58, %s1275_s18 }
 0x10e   : > { %667 = vrot.lane.b32.xlu0 %v1143_v61, %s1275_s18 }
 0x10f   : > { %669 = vrot.lane.b32.xlu1 %v1144_v60, %s1275_s18 }
 0x112   : > { %716 = vrot.lane.b32.xlu0 %v1135_v59, %s1276_s19 }
 0x113   : > { %718 = vrot.lane.b32.xlu1 %v1136_v58, %s1276_s19 }
 0x116   : > { %732 = vrot.lane.b32.xlu0 %v1143_v61, %s1276_s19 }
 0x117   : > { %734 = vrot.lane.b32.xlu1 %v1144_v60, %s1276_s19 }
 0x11a   : > { %780 = vrot.lane.b32.xlu0 %v1135_v59, %s1277_s20 }
 0x11b   : > { %782 = vrot.lane.b32.xlu1 %v1136_v58, %s1277_s20 }
 0x11e   : > { %796 = vrot.lane.b32.xlu0 %v1143_v61, %s1277_s20 }
 0x11f   : > { %798 = vrot.lane.b32.xlu1 %v1144_v60, %s1277_s20 }
 0x122   : > { %655 = vrot.lane.b32.xlu0 %v1137_v63, %s1275_s18 }
 0x123   : > { %657 = vrot.lane.b32.xlu1 %v1138_v62, %s1275_s18 }
 0x126   : > { %671 = vrot.lane.b32.xlu0 %v1145_v1, %s1275_s18 }
 0x127   : > { %673 = vrot.lane.b32.xlu1 %v1146_v0, %s1275_s18 }
 0x12a   : > { %720 = vrot.lane.b32.xlu0 %v1137_v63, %s1276_s19 }
 0x12b   : > { %722 = vrot.lane.b32.xlu1 %v1138_v62, %s1276_s19 }
 0x12e   : > { %736 = vrot.lane.b32.xlu0 %v1145_v1, %s1276_s19 }
 0x12f   : > { %738 = vrot.lane.b32.xlu1 %v1146_v0, %s1276_s19 }
 0x132   : > { %784 = vrot.lane.b32.xlu0 %v1137_v63, %s1277_s20 }
 0x133   : > { %786 = vrot.lane.b32.xlu1 %v1138_v62, %s1277_s20 }
 0x136   : > { %800 = vrot.lane.b32.xlu0 %v1145_v1, %s1277_s20 }
 0x137   : > { %802 = vrot.lane.b32.xlu1 %v1146_v0, %s1277_s20 }
 0x14c   : > { %v646_v3 = vpop.permute.xlu0 %645 }
 0x14d   : > { %v662_v2 = vpop.permute.xlu1 %661  ;;  %693 = vst.msk [vmem:[%s1464_s29 + $0x4] sm:$0xf] %vm691_vm1, %v646_v3 }
 0x14e   : > { %701 = vst.msk [vmem:[%s1464_s29 + $0x24] sm:$0xf] %vm691_vm1, %v662_v2 }
 0x150   : > { %v644_v5 = vpop.permute.xlu0 %643 }
 0x151   : > { %v711_v4 = vpop.permute.xlu1 %710  ;;  %692 = vst.msk [vmem:[%s1464_s29] sm:$0xf] %vm691_vm1, %v644_v5 }
 0x152   : > { %757 = vst.msk [vmem:[%s1473_s8 + $0x4] sm:$0xf] %vm691_vm1, %v711_v4 }
 0x154   : > { %v660_v7 = vpop.permute.xlu0 %659 }
 0x155   : > { %v727_v6 = vpop.permute.xlu1 %726  ;;  %700 = vst.msk [vmem:[%s1464_s29 + $0x20] sm:$0xf] %vm691_vm1, %v660_v7 }
 0x156   : > { %765 = vst.msk [vmem:[%s1473_s8 + $0x24] sm:$0xf] %vm691_vm1, %v727_v6 }
 0x158   : > { %v709_v9 = vpop.permute.xlu0 %708 }
 0x159   : > { %v775_v8 = vpop.permute.xlu1 %774  ;;  %756 = vst.msk [vmem:[%s1473_s8] sm:$0xf] %vm691_vm1, %v709_v9 }
 0x15a   : > { %821 = vst.msk [vmem:[%s1486_s11 + $0x4] sm:$0xf] %vm691_vm1, %v775_v8 }
 0x15c   : > { %v725_v11 = vpop.permute.xlu0 %724 }
 0x15d   : > { %v791_v10 = vpop.permute.xlu1 %790  ;;  %764 = vst.msk [vmem:[%s1473_s8 + $0x20] sm:$0xf] %vm691_vm1, %v725_v11 }
 0x15e   : > { %829 = vst.msk [vmem:[%s1486_s11 + $0x24] sm:$0xf] %vm691_vm1, %v791_v10 }
 0x160   : > { %v773_v13 = vpop.permute.xlu0 %772 }
 0x161   : > { %v650_v12 = vpop.permute.xlu1 %649  ;;  %820 = vst.msk [vmem:[%s1486_s11] sm:$0xf] %vm691_vm1, %v773_v13 }
 0x162   : > { %695 = vst.msk [vmem:[%s1464_s29 + $0xc] sm:$0xf] %vm691_vm1, %v650_v12 }
 0x164   : > { %v789_v15 = vpop.permute.xlu0 %788 }
 0x165   : > { %v666_v14 = vpop.permute.xlu1 %665  ;;  %828 = vst.msk [vmem:[%s1486_s11 + $0x20] sm:$0xf] %vm691_vm1, %v789_v15 }
 0x166   : > { %703 = vst.msk [vmem:[%s1464_s29 + $0x2c] sm:$0xf] %vm691_vm1, %v666_v14 }
 0x168   : > { %v664_v17 = vpop.permute.xlu0 %663 }
 0x169   : > { %v715_v16 = vpop.permute.xlu1 %714  ;;  %702 = vst.msk [vmem:[%s1464_s29 + $0x28] sm:$0xf] %vm691_vm1, %v664_v17 }
 0x16a   : > { %759 = vst.msk [vmem:[%s1473_s8 + $0xc] sm:$0xf] %vm691_vm1, %v715_v16 }
 0x16c   : > { %v713_v19 = vpop.permute.xlu0 %712 }
 0x16d   : > { %v731_v18 = vpop.permute.xlu1 %730  ;;  %758 = vst.msk [vmem:[%s1473_s8 + $0x8] sm:$0xf] %vm691_vm1, %v713_v19 }
 0x16e   : > { %767 = vst.msk [vmem:[%s1473_s8 + $0x2c] sm:$0xf] %vm691_vm1, %v731_v18 }
 0x170   : > { %v729_v21 = vpop.permute.xlu0 %728 }
 0x171   : > { %v779_v20 = vpop.permute.xlu1 %778  ;;  %766 = vst.msk [vmem:[%s1473_s8 + $0x28] sm:$0xf] %vm691_vm1, %v729_v21 }
 0x172   : > { %823 = vst.msk [vmem:[%s1486_s11 + $0xc] sm:$0xf] %vm691_vm1, %v779_v20 }
 0x174   : > { %v777_v23 = vpop.permute.xlu0 %776 }
 0x175   : > { %v795_v22 = vpop.permute.xlu1 %794  ;;  %822 = vst.msk [vmem:[%s1486_s11 + $0x8] sm:$0xf] %vm691_vm1, %v777_v23 }
 0x176   : > { %831 = vst.msk [vmem:[%s1486_s11 + $0x2c] sm:$0xf] %vm691_vm1, %v795_v22 }
 0x178   : > { %v793_v25 = vpop.permute.xlu0 %792 }
 0x179   : > { %v648_v24 = vpop.permute.xlu1 %647  ;;  %830 = vst.msk [vmem:[%s1486_s11 + $0x28] sm:$0xf] %vm691_vm1, %v793_v25 }
 0x17a   : > { %694 = vst.msk [vmem:[%s1464_s29 + $0x8] sm:$0xf] %vm691_vm1, %v648_v24 }
 0x17c   : > { %v652_v27 = vpop.permute.xlu0 %651 }
 0x17d   : > { %v654_v26 = vpop.permute.xlu1 %653  ;;  %696 = vst.msk [vmem:[%s1464_s29 + $0x10] sm:$0xf] %vm691_vm1, %v652_v27 }
 0x17e   : > { %697 = vst.msk [vmem:[%s1464_s29 + $0x14] sm:$0xf] %vm691_vm1, %v654_v26 }
 0x180   : > { %v668_v29 = vpop.permute.xlu0 %667 }
 0x181   : > { %v670_v28 = vpop.permute.xlu1 %669  ;;  %704 = vst.msk [vmem:[%s1464_s29 + $0x30] sm:$0xf] %vm691_vm1, %v668_v29 }
 0x182   : > { %705 = vst.msk [vmem:[%s1464_s29 + $0x34] sm:$0xf] %vm691_vm1, %v670_v28 }
 0x184   : > { %v717_v31 = vpop.permute.xlu0 %716 }
 0x185   : > { %v719_v30 = vpop.permute.xlu1 %718  ;;  %760 = vst.msk [vmem:[%s1473_s8 + $0x10] sm:$0xf] %vm691_vm1, %v717_v31 }
 0x186   : > { %761 = vst.msk [vmem:[%s1473_s8 + $0x14] sm:$0xf] %vm691_vm1, %v719_v30 }
 0x188   : > { %v733_v33 = vpop.permute.xlu0 %732 }
 0x189   : > { %v735_v32 = vpop.permute.xlu1 %734  ;;  %768 = vst.msk [vmem:[%s1473_s8 + $0x30] sm:$0xf] %vm691_vm1, %v733_v33 }
 0x18a   : > { %769 = vst.msk [vmem:[%s1473_s8 + $0x34] sm:$0xf] %vm691_vm1, %v735_v32 }
 0x18c   : > { %v781_v35 = vpop.permute.xlu0 %780 }
 0x18d   : > { %v783_v34 = vpop.permute.xlu1 %782  ;;  %824 = vst.msk [vmem:[%s1486_s11 + $0x10] sm:$0xf] %vm691_vm1, %v781_v35 }
 0x18e   : > { %825 = vst.msk [vmem:[%s1486_s11 + $0x14] sm:$0xf] %vm691_vm1, %v783_v34 }
 0x190   : > { %v797_v37 = vpop.permute.xlu0 %796 }
 0x191   : > { %v799_v36 = vpop.permute.xlu1 %798  ;;  %832 = vst.msk [vmem:[%s1486_s11 + $0x30] sm:$0xf] %vm691_vm1, %v797_v37 }
 0x192   : > { %833 = vst.msk [vmem:[%s1486_s11 + $0x34] sm:$0xf] %vm691_vm1, %v799_v36 }
 0x194   : > { %v656_v39 = vpop.permute.xlu0 %655 }
 0x195   : > { %v658_v38 = vpop.permute.xlu1 %657  ;;  %698 = vst.msk [vmem:[%s1464_s29 + $0x18] sm:$0xf] %vm691_vm1, %v656_v39 }
 0x196   : > { %699 = vst.msk [vmem:[%s1464_s29 + $0x1c] sm:$0xf] %vm691_vm1, %v658_v38 }
 0x198   : > { %v672_v41 = vpop.permute.xlu0 %671 }
 0x199   : > { %v674_v40 = vpop.permute.xlu1 %673  ;;  %706 = vst.msk [vmem:[%s1464_s29 + $0x38] sm:$0xf] %vm691_vm1, %v672_v41 }
 0x19a   : > { %707 = vst.msk [vmem:[%s1464_s29 + $0x3c] sm:$0xf] %vm691_vm1, %v674_v40 }
 0x19c   : > { %v721_v43 = vpop.permute.xlu0 %720 }
 0x19d   : > { %v723_v42 = vpop.permute.xlu1 %722  ;;  %762 = vst.msk [vmem:[%s1473_s8 + $0x18] sm:$0xf] %vm691_vm1, %v721_v43 }
 0x19e   : > { %763 = vst.msk [vmem:[%s1473_s8 + $0x1c] sm:$0xf] %vm691_vm1, %v723_v42 }
 0x1a0   : > { %v737_v45 = vpop.permute.xlu0 %736 }
 0x1a1   : > { %v739_v44 = vpop.permute.xlu1 %738  ;;  %770 = vst.msk [vmem:[%s1473_s8 + $0x38] sm:$0xf] %vm691_vm1, %v737_v45 }
 0x1a2   : > { %771 = vst.msk [vmem:[%s1473_s8 + $0x3c] sm:$0xf] %vm691_vm1, %v739_v44 }
 0x1a4   : > { %v785_v47 = vpop.permute.xlu0 %784 }
 0x1a5   : > { %v787_v46 = vpop.permute.xlu1 %786  ;;  %826 = vst.msk [vmem:[%s1486_s11 + $0x18] sm:$0xf] %vm691_vm1, %v785_v47 }
 0x1a6   : > { %827 = vst.msk [vmem:[%s1486_s11 + $0x1c] sm:$0xf] %vm691_vm1, %v787_v46 }
 0x1a8   : > { %v801_v49 = vpop.permute.xlu0 %800 }
 0x1a9   : > { %v803_v48 = vpop.permute.xlu1 %802  ;;  %834 = vst.msk [vmem:[%s1486_s11 + $0x38] sm:$0xf] %vm691_vm1, %v801_v49 }
 0x1aa   : > { %835 = vst.msk [vmem:[%s1486_s11 + $0x3c] sm:$0xf] %vm691_vm1, %v803_v48 }
 0x1ab PF: > { %s17_s25 = sadd.s32 1, %s1273_s25   ;;  %s1594_s21 = smov %s1265_s23 }
 0x1ac   : > { %p14_p7 = scmp.ge.s32.totalorder %s17_s25, 6   ;;  %s1595_s22 = smov %s1269_s24 }
 0x1ad   : > { %s1596_s23 = smov %s1599_s26  ;;  %s1597_s24 = smov %s1603_s27 }
 0x1ae   :  { %16 = sbr.rel (!%p14_p7) target bundleno = 3 (0x3), region = 98 }

// kernel: attention_block.3
= control target key start
LH: loop header
LB: loop body
LE: loop exit
PB: predicated region body
PF: predicated region fallthrough
CT: control target
= control target key end

     0   :  { %s2570_s24 = smov 0   ;;  %s2572_s25 = smov 0   ;;  %s3217_s0 = inlined_call_operand.vmem [shape: bf16[2,256,8], index: 0, kind: input, shape index: {}]   ;;  %s3218_s1 = inlined_call_operand.vmem [shape: bf16[2,256,8], index: 1, kind: input, shape index: {}]   ;;  %s3219_s2 = inlined_call_operand.vmem [shape: bf16[2,256,8], index: 2, kind: input, shape index: {}]   ;;  %s3220_s3 = inlined_call_operand.vmem [shape: f32[2,256,8], index: 3, kind: input, shape index: {}]   ;;  %s3221_s4 = inlined_call_operand.vmem [shape: f32[2,256,8], index: 4, kind: input, shape index: {}]   ;;  %s3222_s5 = inlined_call_operand.vmem [shape: f32[8,8], index: 5, kind: input, shape index: {}]   ;;  %s3223_s6 = inlined_call_operand.vmem [shape: f32[1,8], index: 6, kind: input, shape index: {}]   ;;  %s3224_s7 = inlined_call_operand.vmem [shape: f32[2,256,8], index: 7, kind: output, shape index: {}]  }
   0x1   :  { %3225 = sst [smem:[#allocation7_spill]] %s3217_s0  ;;  %s2574_s26 = smov 0  }
   0x2   :  { %3226 = sst [smem:[#allocation8_spill]] %s3220_s3  ;;  %s2576_s27 = smov 0  }
   0x3   :  { %s2578_s28 = smov 0   ;;  %s2580_s29 = smov 0  }
   0x4   :  { %s2582_s30 = smov 0  }
   0x5 LB: > { %s29_s8 = sadd.s32 1, %s2512_s27  ;;  %s32_s9 = sadd.s32 1, %s2516_s28  ;;  %s2524_s30 = sphi %s2582_s30, %s17_s30   ;;  %s2520_s29 = sphi %s2580_s29, %s3238_s29   ;;  %s2516_s28 = sphi %s2578_s28, %s3237_s28   ;;  %s2512_s27 = sphi %s2576_s27, %s3236_s27   ;;  %s2508_s26 = sphi %s2574_s26, %s3235_s26   ;;  %s2504_s25 = sphi %s2572_s25, %s3234_s25   ;;  %s2500_s24 = sphi %s2570_s24, %s3233_s24  }
   0x6   : > { %p30_p0 = scmp.ge.s32.totalorder %s29_s8, 2  ;;  %p2065_p1 = scmp.ge.s32.totalorder %s2524_s30, 1 }
   0x7   : > { %p333_p2 = scmp.lt.s32.totalorder %s2524_s30, 9  ;;  %s36_s10 = sadd.s32 1, %s2520_s29 }
   0x8   : > { %s3240_s8 = smov (%p30_p0, %s29_s8), 0  ;;  %s3242_s9 = smov (!%p30_p0, %s32_s9), %s2516_s28 }
   0x9   : > { %p334_p3 = pnand %p2065_p1, %p333_p2  ;;  %p34_p4 = scmp.ge.s32.totalorder %s3242_s9, 2 }
   0xa   : > { %s2066_s11 = sshll.u32 (!%p334_p3), %s2504_s25, 4  ;;  %p410_p6 = scmp.lt.s32.totalorder (!%p334_p3), %s2508_s26, 1 }
   0xb   : > { %s3244_s9 = smov (%p34_p4, %s3242_s9), 0  ;;  %s3246_s10 = smov (!%p34_p4, %s36_s10), %s2520_s29 }
   0xc   : > { %3227 = sst [smem:[#allocation5_spill]] %s3244_s9  ;;  %p38_p5 = scmp.ge.s32.totalorder %s3246_s10, 2 }
   0xd   : > { %337 = sbr.rel (%p334_p3) target bundleno = 1214 (0x4be), region = 48  ;;  %p412_p7 = scmp.lt.s32.totalorder (!%p334_p3), %s2066_s11, 31 }
   0xe   : > { %s3248_s10 = smov (%p38_p5, %s3246_s10), 0  ;;  %s2069_s12 = sshll.u32 (!%p334_p3), %s2500_s24, 4 }
   0xf   : > { %3228 = sst [smem:[#allocation6_spill]] %s3248_s10  ;;  %p422_p8 = scmp.lt.s32.totalorder (!%p334_p3), %s2069_s12, 31 }
  0x10   : > { %s3229_s0 = sld [smem:[#allocation7_spill]] (!%p334_p3)  ;;  %p2084_p9 = scmp.ne.s32.totalorder (!%p334_p3), %s2500_s24, 0 }
  0x11   : > { %s3230_s3 = sld [smem:[#allocation8_spill]] (!%p334_p3) }
  0x12   : > { %s3250_s26 = smov (!%p410_p6, %s2508_s26), 1  ;;  %s3252_s11 = smov (!%p412_p7, %s2066_s11), 31 }
  0x13   : > { %s2067_s13 = sshll.u32 %s3250_s26, 5  ;;  %s3254_s12 = smov (!%p422_p8, %s2069_s12), 31 }
  0x14   : > { %s415_s14 = sadd.s32 %s2067_s13, %s3252_s11  ;;  %s425_s9 = sadd.s32 %s2067_s13, %s3254_s12 }
  0x15   : > { %s2068_s15 = sshll.u32 %s415_s14, 2  ;;  %s2077_s16 = sshll.u32 %s415_s14, 3 }
  0x16   : > { %s2618_s19 = scalar_lea.vmem %s3229_s0, %s2068_s15  ;;  %s2628_s10 = scalar_lea.vmem %s3221_s4, %s2077_s16 }
  0x17   : > { %s2623_s22 = scalar_lea.vmem %s3230_s3, %s2077_s16  ;;  %s2633_s14 = scalar_lea.vmem %s3224_s7, %s2077_s16 }
  0x18   : > { %s2071_s17 = sshll.u32 %s425_s9, 2  ;;  %473 = sbr.rel (%p2084_p9) target bundleno = 54 (0x36), region = 52 }
  0x19   : > { %s2638_s0 = scalar_lea.vmem %s3218_s1, %s2071_s17  ;;  %s2643_s3 = scalar_lea.vmem %s3219_s2, %s2071_s17 }
  0x1d   : > { %vm474_vm0 = vcmask 7168   ;;  %vm507_vm1 = vcmask 64512   ;;  %v2526_v0 = vmov -inf   ;;  %v2527_v1 = vmov 0.0  }
  0x1e   : > { %475 = vst.msk [vmem:[#allocation2] sm:$0xff] %vm474_vm0, %v2526_v0  ;;  %476 = vst.msk [vmem:[#allocation2 + $0x8] sm:$0xff] %vm474_vm0, %v2526_v0 }
  0x1f   : > { %477 = vst.msk [vmem:[#allocation2 + $0x10] sm:$0xff] %vm474_vm0, %v2526_v0  ;;  %478 = vst.msk [vmem:[#allocation2 + $0x18] sm:$0xff] %vm474_vm0, %v2526_v0 }
  0x20   : > { %479 = vst.msk [vmem:[#allocation2 + $0x20] sm:$0xff] %vm474_vm0, %v2526_v0  ;;  %480 = vst.msk [vmem:[#allocation2 + $0x28] sm:$0xff] %vm474_vm0, %v2526_v0 }
  0x21   : > { %481 = vst.msk [vmem:[#allocation2 + $0x30] sm:$0xff] %vm474_vm0, %v2526_v0  ;;  %482 = vst.msk [vmem:[#allocation2 + $0x38] sm:$0xff] %vm474_vm0, %v2526_v0 }
  0x22   : > { %483 = vst.msk [vmem:[#allocation2 + $0x40] sm:$0xff] %vm474_vm0, %v2526_v0  ;;  %484 = vst.msk [vmem:[#allocation2 + $0x48] sm:$0xff] %vm474_vm0, %v2526_v0 }
  0x23   : > { %485 = vst.msk [vmem:[#allocation2 + $0x50] sm:$0xff] %vm474_vm0, %v2526_v0  ;;  %486 = vst.msk [vmem:[#allocation2 + $0x58] sm:$0xff] %vm474_vm0, %v2526_v0 }
  0x24   : > { %487 = vst.msk [vmem:[#allocation2 + $0x60] sm:$0xff] %vm474_vm0, %v2526_v0  ;;  %488 = vst.msk [vmem:[#allocation2 + $0x68] sm:$0xff] %vm474_vm0, %v2526_v0 }
  0x25   : > { %489 = vst.msk [vmem:[#allocation2 + $0x70] sm:$0xff] %vm474_vm0, %v2526_v0  ;;  %490 = vst.msk [vmem:[#allocation2 + $0x78] sm:$0xff] %vm474_vm0, %v2526_v0 }
  0x26   : > { %491 = vst.msk [vmem:[#allocation3] sm:$0xff] %vm474_vm0, %v2527_v1  ;;  %492 = vst.msk [vmem:[#allocation3 + $0x8] sm:$0xff] %vm474_vm0, %v2527_v1 }
  0x27   : > { %493 = vst.msk [vmem:[#allocation3 + $0x10] sm:$0xff] %vm474_vm0, %v2527_v1  ;;  %494 = vst.msk [vmem:[#allocation3 + $0x18] sm:$0xff] %vm474_vm0, %v2527_v1 }
  0x28   : > { %495 = vst.msk [vmem:[#allocation3 + $0x20] sm:$0xff] %vm474_vm0, %v2527_v1  ;;  %496 = vst.msk [vmem:[#allocation3 + $0x28] sm:$0xff] %vm474_vm0, %v2527_v1 }
  0x29   : > { %497 = vst.msk [vmem:[#allocation3 + $0x30] sm:$0xff] %vm474_vm0, %v2527_v1  ;;  %498 = vst.msk [vmem:[#allocation3 + $0x38] sm:$0xff] %vm474_vm0, %v2527_v1 }
  0x2a   : > { %499 = vst.msk [vmem:[#allocation3 + $0x40] sm:$0xff] %vm474_vm0, %v2527_v1  ;;  %500 = vst.msk [vmem:[#allocation3 + $0x48] sm:$0xff] %vm474_vm0, %v2527_v1 }
  0x2b   : > { %501 = vst.msk [vmem:[#allocation3 + $0x50] sm:$0xff] %vm474_vm0, %v2527_v1  ;;  %502 = vst.msk [vmem:[#allocation3 + $0x58] sm:$0xff] %vm474_vm0, %v2527_v1 }
  0x2c   : > { %503 = vst.msk [vmem:[#allocation3 + $0x60] sm:$0xff] %vm474_vm0, %v2527_v1  ;;  %504 = vst.msk [vmem:[#allocation3 + $0x68] sm:$0xff] %vm474_vm0, %v2527_v1 }
  0x2d   : > { %505 = vst.msk [vmem:[#allocation3 + $0x70] sm:$0xff] %vm474_vm0, %v2527_v1  ;;  %506 = vst.msk [vmem:[#allocation3 + $0x78] sm:$0xff] %vm474_vm0, %v2527_v1 }
  0x2e   : > { %508 = vst.msk [vmem:[#allocation4] sm:$0xff] %vm507_vm1, %v2527_v1  ;;  %509 = vst.msk [vmem:[#allocation4 + $0x8] sm:$0xff] %vm507_vm1, %v2527_v1 }
  0x2f   : > { %510 = vst.msk [vmem:[#allocation4 + $0x10] sm:$0xff] %vm507_vm1, %v2527_v1  ;;  %511 = vst.msk [vmem:[#allocation4 + $0x18] sm:$0xff] %vm507_vm1, %v2527_v1 }
  0x30   : > { %512 = vst.msk [vmem:[#allocation4 + $0x20] sm:$0xff] %vm507_vm1, %v2527_v1  ;;  %513 = vst.msk [vmem:[#allocation4 + $0x28] sm:$0xff] %vm507_vm1, %v2527_v1 }
  0x31   : > { %514 = vst.msk [vmem:[#allocation4 + $0x30] sm:$0xff] %vm507_vm1, %v2527_v1  ;;  %515 = vst.msk [vmem:[#allocation4 + $0x38] sm:$0xff] %vm507_vm1, %v2527_v1 }
  0x32   : > { %516 = vst.msk [vmem:[#allocation4 + $0x40] sm:$0xff] %vm507_vm1, %v2527_v1  ;;  %517 = vst.msk [vmem:[#allocation4 + $0x48] sm:$0xff] %vm507_vm1, %v2527_v1 }
  0x33   : > { %518 = vst.msk [vmem:[#allocation4 + $0x50] sm:$0xff] %vm507_vm1, %v2527_v1  ;;  %519 = vst.msk [vmem:[#allocation4 + $0x58] sm:$0xff] %vm507_vm1, %v2527_v1 }
  0x34   : > { %520 = vst.msk [vmem:[#allocation4 + $0x60] sm:$0xff] %vm507_vm1, %v2527_v1  ;;  %521 = vst.msk [vmem:[#allocation4 + $0x68] sm:$0xff] %vm507_vm1, %v2527_v1 }
  0x35   : > { %522 = vst.msk [vmem:[#allocation4 + $0x70] sm:$0xff] %vm507_vm1, %v2527_v1  ;;  %523 = vst.msk [vmem:[#allocation4 + $0x78] sm:$0xff] %vm507_vm1, %v2527_v1 }
  0x36 PF: > { %v2348_v2 = vld [vmem:[%s2638_s0 + $0x38] sm:$0xff]   ;;  %vm636_vm2 = vcmask 64512   ;;  %v2349_v3 = vld [vmem:[%s2638_s0 + $0x30] sm:$0xff]   ;;  %v2350_v5 = vld [vmem:[%s2638_s0 + $0x28] sm:$0xff]   ;;  %v2528_v33 = vmov 0   ;;  %vm1102_vm3 = vcmask 7168  }
  0x37   : > { %2278 = vmatprep.subr.msk.bf16.mxu0 %vm636_vm2, %v2348_v2  ;;  %v683_v4 = vsel %vm636_vm2, %v2348_v2, 0  ;;  %v680_v6 = vsel %vm636_vm2, %v2349_v3, 0  ;;  %v2356_v7 = vld [vmem:[%s2618_s19] sm:$0xff]   ;;  %v677_v8 = vsel %vm636_vm2, %v2350_v5, 0  ;;  %v2352_v11 = vld [vmem:[%s2638_s0 + $0x18] sm:$0xff]   ;;  %v2353_v13 = vld [vmem:[%s2638_s0 + $0x10] sm:$0xff]   ;;  %2347 = vset.pattern.permute.xlu1 %v2528_v33 }
  0x38   : > { %2187 = vmatpush3.bf16.xpose.msra.mxu0 %v683_v4  ;;  %2202 = vmatprep.mubr.msk.bf16.mxu0 %vm636_vm2, %v2356_v7  ;;  %v2351_v9 = vld [vmem:[%s2638_s0 + $0x20] sm:$0xff]   ;;  %v671_v12 = vsel %vm636_vm2, %v2352_v11, 0  ;;  %v668_v14 = vsel %vm636_vm2, %v2353_v13, 0  ;;  %v2354_v15 = vld [vmem:[%s2638_s0 + $0x8] sm:$0xff]   ;;  %v2358_v20 = vld [vmem:[%s2618_s19 + $0x10] sm:$0xff]   ;;  %p2117_p10 = scmp.ne.s32.totalorder %s2500_s24, 1 }
  0x39   : > { %2279 = vmatprep.subr.msk.bf16.mxu0 %vm636_vm2, %v2349_v3  ;;  %v674_v10 = vsel %vm636_vm2, %v2351_v9, 0  ;;  %v665_v16 = vsel %vm636_vm2, %v2354_v15, 0  ;;  %v2355_v17 = vld [vmem:[%s2638_s0] sm:$0xff]   ;;  %v2357_v19 = vld [vmem:[%s2618_s19 + $0x8] sm:$0xff]   ;;  %v2359_v21 = vld [vmem:[%s2618_s19 + $0x18] sm:$0xff]   ;;  %2346 = vset.pattern.permute.xlu0 %v2528_v33 }
  0x3a   : > { %v662_v18 = vsel %vm636_vm2, %v2355_v17, 0  ;;  %v2360_v22 = vld [vmem:[%s2618_s19 + $0x20] sm:$0xff]   ;;  %v2361_v23 = vld [vmem:[%s2618_s19 + $0x28] sm:$0xff]   ;;  %v2362_v24 = vld [vmem:[%s2618_s19 + $0x30] sm:$0xff]  }
  0x3b   : > { %v2363_v25 = vld [vmem:[%s2618_s19 + $0x38] sm:$0xff]   ;;  %v2783_v44 = vld [vmem:[#allocation2 + $0x10] sm:$0xff]  ;;  %v2786_v47 = vld [vmem:[#allocation2] sm:$0xff] }
  0x3c   : > { %v2364_v43 = vld [vmem:[%s2643_s3 + $0x38] sm:$0xff]   ;;  %v2365_v45 = vld [vmem:[%s2643_s3 + $0x30] sm:$0xff]   ;;  %v2366_v51 = vld [vmem:[%s2643_s3 + $0x28] sm:$0xff]  }
  0x3d   : > { %2218 = vmatprep.subr.bf16.mxu1 %v2364_v43  ;;  %v2791_v50 = vld [vmem:[#allocation2 + $0x18] sm:$0xff]  ;;  %v2800_v54 = vld [vmem:[#allocation2 + $0x8] sm:$0xff]  ;;  %v2367_v57 = vld [vmem:[%s2643_s3 + $0x20] sm:$0xff]  }
  0x3e   : > { %2219 = vmatpush3.bf16.msra.mxu1 %v2364_v43  ;;  %v2815_v59 = vld [vmem:[#allocation2 + $0x20] sm:$0xff]  ;;  %v2819_v61 = vld [vmem:[#allocation2 + $0x38] sm:$0xff]  ;;  %v2826_v1 = vld [vmem:[#allocation2 + $0x30] sm:$0xff] }
  0x3f   : > { %2220 = vmatprep.subr.bf16.mxu1 %v2365_v45  ;;  %v2368_v62 = vld [vmem:[%s2643_s3 + $0x18] sm:$0xff]   ;;  %v2833_v4 = vld [vmem:[#allocation2 + $0x28] sm:$0xff] }
  0x40   : > { %2189 = vmatpush3.bf16.xpose.msra.mxu0 %v680_v6 }
  0x41   : > { %2280 = vmatprep.subr.msk.bf16.mxu0 %vm636_vm2, %v2350_v5  ;;  %v2369_v5 = vld [vmem:[%s2643_s3 + $0x10] sm:$0xff]  }
  0x42   : > { %2221 = vmatpush3.bf16.msra.mxu1 %v2365_v45  ;;  %v2880_v45 = vld [vmem:[#allocation2 + $0x78] sm:$0xff] }
  0x43   : > { %2222 = vmatprep.subr.bf16.mxu1 %v2366_v51 }
  0x46   : > { %2223 = vmatpush3.bf16.msra.mxu1 %v2366_v51  ;;  %v2888_v51 = vld [vmem:[#allocation2 + $0x70] sm:$0xff] }
  0x47   : > { %2224 = vmatprep.subr.bf16.mxu1 %v2367_v57 }
  0x48   : > { %2191 = vmatpush3.bf16.xpose.msra.mxu0 %v677_v8  ;;  %v2841_v8 = vld [vmem:[#allocation2 + $0x40] sm:$0xff] }
  0x49   : > { %2281 = vmatprep.subr.msk.bf16.mxu0 %vm636_vm2, %v2351_v9 }
  0x4a   : > { %2225 = vmatpush3.bf16.msra.mxu1 %v2367_v57 }
  0x4b   : > { %2226 = vmatprep.subr.bf16.mxu1 %v2368_v62 }
  0x4e   : > { %2227 = vmatpush3.bf16.msra.mxu1 %v2368_v62 }
  0x4f   : > { %2228 = vmatprep.subr.bf16.mxu1 %v2369_v5 }
  0x50   : > { %2193 = vmatpush3.bf16.xpose.msra.mxu0 %v674_v10 }
  0x51   : > { %2282 = vmatprep.subr.msk.bf16.mxu0 %vm636_vm2, %v2352_v11  ;;  %v2849_v11 = vld [vmem:[#allocation2 + $0x58] sm:$0xff] }
  0x52   : > { %2229 = vmatpush3.bf16.msra.mxu1 %v2369_v5 }
  0x58   : > { %2195 = vmatpush3.bf16.xpose.msra.mxu0 %v671_v12  ;;  %v2370_v12 = vld [vmem:[%s2643_s3 + $0x8] sm:$0xff]  }
  0x59   : > { %2283 = vmatprep.subr.msk.bf16.mxu0 %vm636_vm2, %v2353_v13  ;;  %2230 = vmatprep.subr.bf16.mxu1 %v2370_v12 }
  0x5a   : > { %2231 = vmatpush3.bf16.msra.mxu1 %v2370_v12 }
  0x60   : > { %2197 = vmatpush3.bf16.xpose.msra.mxu0 %v668_v14 }
  0x61   : > { %2284 = vmatprep.subr.msk.bf16.mxu0 %vm636_vm2, %v2354_v15  ;;  %v2857_v15 = vld [vmem:[#allocation2 + $0x50] sm:$0xff] }
  0x68   : > { %2199 = vmatpush3.bf16.xpose.msra.mxu0 %v665_v16 }
  0x69   : > { %2285 = vmatprep.subr.msk.bf16.mxu0 %vm636_vm2, %v2355_v17 }
  0x70   : > { %2201 = vmatpush3.bf16.xpose.msra.mxu0 %v662_v18 }
  0x77   : > { %2203 = vmatmul.mubr.msk.bf16.vlgmr.msra.gmra.mxu0 %vm636_vm2, %v2357_v19  ;;  %v2865_v19 = vld [vmem:[#allocation2 + $0x48] sm:$0xff] }
  0x78   : > { %2206 = vmatprep.mubr.msk.bf16.mxu0 %vm636_vm2, %v2358_v20  ;;  %v2371_v20 = vld [vmem:[%s2643_s3] sm:$0xff]  }
  0x79   : > { %2232 = vmatprep.subr.bf16.mxu1 %v2371_v20 }
  0x7a   : > { %2233 = vmatpush3.bf16.msra.mxu1 %v2371_v20 }
  0x7f   : > { %2207 = vmatmul.mubr.msk.bf16.gmra.mxu0 %vm636_vm2, %v2359_v21 }
  0x80   : > { %2210 = vmatprep.mubr.msk.bf16.mxu0 %vm636_vm2, %v2360_v22 }
  0x87   : > { %2211 = vmatmul.mubr.msk.bf16.gmra.mxu0 %vm636_vm2, %v2361_v23 }
  0x88   : > { %2214 = vmatprep.mubr.msk.bf16.mxu0 %vm636_vm2, %v2362_v24  ;;  %v2874_v24 = vld [vmem:[#allocation2 + $0x60] sm:$0xff] }
  0x8f   : > { %2215 = vmatmul.mubr.msk.bf16.gmra.mxu0 %vm636_vm2, %v2363_v25 }
 0x137   : > { %v2734_v26 = vpop.f32.mrf.mxu0 }
 0x138   : > { %802 = vmax.xlane.f32.xlu1 %v2734_v26 }
 0x139   : > { %v2737_v27 = vpop.f32.mrf.mxu0 }
 0x13a   : > { %798 = vmax.xlane.f32.xlu0 %v2737_v27 }
 0x13b   : > { %v2740_v28 = vpop.f32.mrf.mxu0 }
 0x13c   : > { %804 = vmax.xlane.f32.xlu1 %v2740_v28 }
 0x13d   : > { %v2743_v29 = vpop.f32.mrf.mxu0 }
 0x13e   : > { %800 = vmax.xlane.f32.xlu0 %v2743_v29 }
 0x13f   : > { %v2746_v30 = vpop.f32.mrf.mxu0 }
 0x141   : > { %v2748_v31 = vpop.f32.mrf.mxu0 }
 0x142   : > { %806 = vmax.xlane.f32.xlu0 %v2748_v31 }
 0x143   : > { %v2751_v32 = vpop.f32.mrf.mxu0 }
 0x144   : > { %812 = vmax.xlane.f32.xlu1 %v2751_v32 }
 0x145   : > { %v2754_v34 = vpop.f32.mrf.mxu0 }
 0x146   : > { %810 = vmax.xlane.f32.xlu0 %v2746_v30 }
 0x147   : > { %v2757_v35 = vpop.f32.mrf.mxu0 }
 0x148   : > { %808 = vmax.xlane.f32.xlu1 %v2754_v34 }
 0x149   : > { %v2760_v36 = vpop.f32.mrf.mxu0 }
 0x14a   : > { %814 = vmax.xlane.f32.xlu0 %v2760_v36 }
 0x14b   : > { %v2763_v37 = vpop.f32.mrf.mxu0 }
 0x14c   : > { %820 = vmax.xlane.f32.xlu1 %v2763_v37 }
 0x14d   : > { %v2766_v38 = vpop.f32.mrf.mxu0 }
 0x14e   : > { %818 = vmax.xlane.f32.xlu0 %v2757_v35 }
 0x14f   : > { %v2769_v39 = vpop.f32.mrf.mxu0 }
 0x150   : > { %816 = vmax.xlane.f32.xlu1 %v2766_v38 }
 0x151   : > { %v2772_v40 = vpop.f32.mrf.mxu0 }
 0x152   : > { %822 = vmax.xlane.f32.xlu0 %v2772_v40 }
 0x153   : > { %v2775_v41 = vpop.f32.mrf.mxu0 }
 0x154   : > { %828 = vmax.xlane.f32.xlu1 %v2775_v41 }
 0x155   : > { %v2779_v42 = vpop.f32.mrf.mxu0 }
 0x156   : > { %826 = vmax.xlane.f32.xlu0 %v2769_v39 }
 0x158   : > { %824 = vmax.xlane.f32.xlu1 %v2779_v42 }
 0x1c1   : > { %v803_v46 = vpop.xlane.xlu1 %802 }
 0x1c2   : > { %v2789_v48 = vmax.f32 %v2783_v44, %v803_v46 }
 0x1c3   : > { %v799_v49 = vpop.xlane.xlu0 %798 }
 0x1c4   : > { %1434 = vst.msk [vmem:[#allocation2 + $0x10] sm:$0xff] %vm1102_vm3, %v2789_v48  ;;  %v2797_v52 = vmax.f32 %v2786_v47, %v799_v49  ;;  %906 = vperm.xlu1 %2347, %v2789_v48  }
 0x1c5   : > { %v805_v53 = vpop.xlane.xlu1 %804 }
 0x1c6   : > { %1432 = vst.msk [vmem:[#allocation2] sm:$0xff] %vm1102_vm3, %v2797_v52  ;;  %v2805_v55 = vmax.f32 %v2791_v50, %v805_v53  ;;  %896 = vperm.xlu0 %2346, %v2797_v52   ;;  %v846_v16 = vsub.f32 %v2786_v47, %v2797_v52 }
 0x1c7   : > { %v801_v56 = vpop.xlane.xlu0 %800 }
 0x1c8   : > { %1435 = vst.msk [vmem:[#allocation2 + $0x18] sm:$0xff] %vm1102_vm3, %v2805_v55  ;;  %v2812_v58 = vmax.f32 %v2800_v54, %v801_v56  ;;  %911 = vperm.xlu1 %2347, %v2805_v55   ;;  %v849_v22 = vsub.f32 %v2791_v50, %v2805_v55  ;;  %v862_v25 = vmul.f32 1.442695, %v846_v16  ;;  %v795_v55 = vld [vmem:[#allocation2 + $0x68] sm:$0xff]  ;;  %v848_v56 = vsub.f32 %v2783_v44, %v2789_v48 }
 0x1ca   : > { %1433 = vst.msk [vmem:[#allocation2 + $0x8] sm:$0xff] %vm1102_vm3, %v2812_v58  ;;  %v847_v46 = vsub.f32 %v2800_v54, %v2812_v58  ;;  %v868_v49 = vmul.f32 1.442695, %v849_v22  ;;  %2372 = vpow2.f32 %v862_v25 }
 0x1cb   : > { %v807_v60 = vpop.xlane.xlu0 %806 }
 0x1cc   : > { %v2823_v63 = vmax.f32 %v2815_v59, %v807_v60  ;;  %901 = vperm.xlu1 %2347, %v2812_v58   ;;  %v864_v57 = vmul.f32 1.442695, %v847_v46  ;;  %2374 = vpow2.f32 %v868_v49 }
 0x1cd   : > { %v813_v0 = vpop.xlane.xlu1 %812 }
 0x1ce   : > { %1436 = vst.msk [vmem:[#allocation2 + $0x20] sm:$0xff] %vm1102_vm3, %v2823_v63  ;;  %v2831_v2 = vmax.f32 %v2819_v61, %v813_v0  ;;  %2376 = vpow2.f32 %v864_v57 }
 0x1cf   : > { %v811_v3 = vpop.xlane.xlu0 %810 }
 0x1d0   : > { %1439 = vst.msk [vmem:[#allocation2 + $0x38] sm:$0xff] %vm1102_vm3, %v2831_v2  ;;  %v2839_v6 = vmax.f32 %v2826_v1, %v811_v3  ;;  %v853_v52 = vsub.f32 %v2819_v61, %v2831_v2  ;;  %v850_v3 = vsub.f32 %v2815_v59, %v2823_v63 }
 0x1d1   : > { %v809_v7 = vpop.xlane.xlu1 %808 }
 0x1d2   : > { %1438 = vst.msk [vmem:[#allocation2 + $0x30] sm:$0xff] %vm1102_vm3, %v2839_v6  ;;  %v2846_v9 = vmax.f32 %v2833_v4, %v809_v7  ;;  %926 = vperm.xlu1 %2347, %v2839_v6   ;;  %v876_v62 = vmul.f32 1.442695, %v853_v52  ;;  %v870_v7 = vmul.f32 1.442695, %v850_v3 }
 0x1d3   : > { %v815_v10 = vpop.xlane.xlu0 %814 }
 0x1d4   : > { %1437 = vst.msk [vmem:[#allocation2 + $0x28] sm:$0xff] %vm1102_vm3, %v2846_v9  ;;  %v2855_v13 = vmax.f32 %v2841_v8, %v815_v10  ;;  %v851_v0 = vsub.f32 %v2833_v4, %v2846_v9  ;;  %2378 = vpow2.f32 %v876_v62 }
 0x1d5   : > { %v821_v14 = vpop.xlane.xlu1 %820 }
 0x1d6   : > { %1440 = vst.msk [vmem:[#allocation2 + $0x40] sm:$0xff] %vm1102_vm3, %v2855_v13  ;;  %v841_v17 = vmax.f32 %v2849_v11, %v821_v14  ;;  %916 = vperm.xlu1 %2347, %v2823_v63   ;;  %v872_v5 = vmul.f32 1.442695, %v851_v0  ;;  %v854_v16 = vsub.f32 %v2841_v8, %v2855_v13 }
 0x1d7   : > { %v819_v18 = vpop.xlane.xlu0 %818  ;;  %v2924_v63 = vpop.eup %2372 }
 0x1d8   : > { %1443 = vst.msk [vmem:[#allocation2 + $0x58] sm:$0xff] %vm1102_vm3, %v841_v17  ;;  %v2870_v21 = vmax.f32 %v2857_v15, %v819_v18  ;;  %v857_v4 = vsub.f32 %v2849_v11, %v841_v17  ;;  %v878_v20 = vmul.f32 1.442695, %v854_v16 }
 0x1d9   : > { %v817_v23 = vpop.xlane.xlu1 %816  ;;  %v2929_v14 = vpop.eup %2374 }
 0x1da   : > { %1442 = vst.msk [vmem:[#allocation2 + $0x50] sm:$0xff] %vm1102_vm3, %v2870_v21  ;;  %v839_v33 = vmax.f32 %v2865_v19, %v817_v23  ;;  %921 = vperm.xlu1 %2347, %v2846_v9   ;;  %v852_v9 = vsub.f32 %v2826_v1, %v2839_v6  ;;  %v884_v10 = vmul.f32 1.442695, %v857_v4  ;;  %v856_v11 = vsub.f32 %v2857_v15, %v2870_v21 }
 0x1db   : > { %v823_v43 = vpop.xlane.xlu0 %822  ;;  %v2935_v18 = vpop.eup %2376 }
 0x1dc   : > { %1441 = vst.msk [vmem:[#allocation2 + $0x48] sm:$0xff] %vm1102_vm3, %v839_v33  ;;  %v2886_v47 = vmax.f32 %v2874_v24, %v823_v43  ;;  %941 = vperm.xlu0 %2346, %v839_v33   ;;  %v855_v59 = vsub.f32 %v2865_v19, %v839_v33  ;;  %v874_v12 = vmul.f32 1.442695, %v852_v9 }
 0x1dd   : > { %v829_v50 = vpop.xlane.xlu1 %828 }
 0x1de   : > { %1444 = vst.msk [vmem:[#allocation2 + $0x60] sm:$0xff] %vm1102_vm3, %v2886_v47  ;;  %v2895_v53 = vmax.f32 %v2880_v45, %v829_v50  ;;  %931 = vperm.xlu1 %2347, %v2831_v2   ;;  %v866_v2 = vmul.f32 1.442695, %v848_v56  ;;  %v880_v1 = vmul.f32 1.442695, %v855_v59 }
 0x1df   : > { %v827_v54 = vpop.xlane.xlu0 %826 }
 0x1e0   : > { %v861_v58 = vsub.f32 %v2880_v45, %v2895_v53  ;;  %1447 = vst.msk [vmem:[#allocation2 + $0x78] sm:$0xff] %vm1102_vm3, %v2895_v53  ;;  %v2905_v60 = vmax.f32 %v2888_v51, %v827_v54  ;;  %951 = vperm.xlu0 %2346, %v841_v17   ;;  %2380 = vpow2.f32 %v866_v2  ;;  %v882_v17 = vmul.f32 1.442695, %v856_v11 }
 0x1e1   : > { %v825_v61 = vpop.xlane.xlu1 %824  ;;  %2382 = vpow2.f32 %v872_v5  ;;  %v2938_v19 = vpop.eup %2378 }
 0x1e2   : > { %v860_v44 = vsub.f32 %v2888_v51, %v2905_v60  ;;  %1446 = vst.msk [vmem:[#allocation2 + $0x70] sm:$0xff] %vm1102_vm3, %v2905_v60  ;;  %v843_v48 = vmax.f32 %v795_v55, %v825_v61  ;;  %936 = vperm.xlu1 %2347, %v2855_v13   ;;  %2384 = vpow2.f32 %v870_v7 }
 0x1e3   : > { %2386 = vpow2.f32 %v884_v10 }
 0x1e4   : > { %1445 = vst.msk [vmem:[#allocation2 + $0x68] sm:$0xff] %vm1102_vm3, %v843_v48  ;;  %961 = vperm.xlu0 %2346, %v843_v48   ;;  %v859_v6 = vsub.f32 %v795_v55, %v843_v48  ;;  %2388 = vpow2.f32 %v874_v12 }
 0x1e5   : > { %2390 = vpow2.f32 %v880_v1 }
 0x1e6   : > { %946 = vperm.xlu1 %2347, %v2870_v21   ;;  %v888_v15 = vmul.f32 1.442695, %v859_v6  ;;  %2392 = vpow2.f32 %v882_v17  ;;  %v858_v21 = vsub.f32 %v2874_v24, %v2886_v47 }
 0x1e8   : > { %971 = vperm.xlu0 %2346, %v2895_v53   ;;  %2394 = vpow2.f32 %v888_v15  ;;  %v886_v13 = vmul.f32 1.442695, %v858_v21 }
 0x1e9   : > { %2396 = vpow2.f32 %v878_v20 }
 0x1ea   : > { %956 = vperm.xlu1 %2347, %v2886_v47   ;;  %2398 = vpow2.f32 %v886_v13 }
 0x1ec   : > { %1137 = vperm.xlu0 %2346, %v2924_v63  }
 0x1ed   : > { %v2943_v22 = vpop.eup %2380 }
 0x1ee   : > { %966 = vperm.xlu1 %2347, %v2905_v60   ;;  %v2946_v8 = vpop.eup %2382 }
 0x1ef   : > { %v2949_v23 = vpop.eup %2384 }
 0x1f0   : > { %1152 = vperm.xlu0 %2346, %v2929_v14   ;;  %v2952_v25 = vpop.eup %2386 }
 0x1f1   : > { %v2955_v24 = vpop.eup %2388 }
 0x1f2   : > { %1142 = vperm.xlu1 %2347, %v2935_v18   ;;  %v2958_v33 = vpop.eup %2390 }
 0x1f3   : > { %v2961_v43 = vpop.eup %2392 }
 0x1f4   : > { %1172 = vperm.xlu0 %2346, %v2938_v19  }
 0x1f5   : > { %v2964_v46 = vpop.eup %2394 }
 0x1f6   : > { %1147 = vperm.xlu1 %2347, %v2943_v22   ;;  %v2967_v47 = vpop.eup %2396 }
 0x1f7   : > { %v2970_v49 = vpop.eup %2398 }
 0x1f8   : > { %1162 = vperm.xlu0 %2346, %v2946_v8  }
 0x1fa   : > { %1157 = vperm.xlu1 %2347, %v2949_v23  }
 0x1fc   : > { %1192 = vperm.xlu0 %2346, %v2952_v25  }
 0x1fe   : > { %1167 = vperm.xlu1 %2347, %v2955_v24  }
 0x200   : > { %1182 = vperm.xlu0 %2346, %v2958_v33  }
 0x202   : > { %1187 = vperm.xlu1 %2347, %v2961_v43  }
 0x204   : > { %1202 = vperm.xlu0 %2346, %v2964_v46  }
 0x206   : > { %1177 = vperm.xlu1 %2347, %v2967_v47  }
 0x20a   : > { %1197 = vperm.xlu1 %2347, %v2970_v49  }
 0x23f   : > { %v907_v50 = vpop.permute.xlu1 %906 }
 0x240   : > { %v976_v52 = vsub.f32 %v2734_v26, %v907_v50 }
 0x241   : > { %v897_v54 = vpop.permute.xlu0 %896 }
 0x242   : > { %v994_v55 = vmul.f32 1.442695, %v976_v52  ;;  %v974_v56 = vsub.f32 %v2737_v27, %v897_v54 }
 0x243   : > { %v912_v57 = vpop.permute.xlu1 %911 }
 0x244   : > { %2400 = vpow2.f32 %v994_v55  ;;  %v990_v61 = vmul.f32 1.442695, %v974_v56  ;;  %v977_v62 = vsub.f32 %v2740_v28, %v912_v57 }
 0x246   : > { %2402 = vpow2.f32 %v990_v61  ;;  %v996_v0 = vmul.f32 1.442695, %v977_v62 }
 0x247   : > { %v902_v48 = vpop.permute.xlu1 %901 }
 0x248   : > { %v975_v2 = vsub.f32 %v2743_v29, %v902_v48  ;;  %2404 = vpow2.f32 %v996_v0 }
 0x24a   : > { %v992_v3 = vmul.f32 1.442695, %v975_v2 }
 0x24c   : > { %2406 = vpow2.f32 %v992_v3 }
 0x24d   : > { %v927_v5 = vpop.permute.xlu1 %926 }
 0x24e   : > { %v980_v26 = vsub.f32 %v2746_v30, %v927_v5 }
 0x250   : > { %v1002_v4 = vmul.f32 1.442695, %v980_v26 }
 0x251   : > { %v2401_v7 = vpop.eup %2400  ;;  %v917_v9 = vpop.permute.xlu1 %916 }
 0x252   : > { %2408 = vpow2.f32 %v1002_v4  ;;  %v978_v27 = vsub.f32 %v2748_v31, %v917_v9  ;;  %1058 = vadd.xlane.f32.xlu0 %v2401_v7 }
 0x253   : > { %v2403_v10 = vpop.eup %2402 }
 0x254   : > { %v998_v28 = vmul.f32 1.442695, %v978_v27  ;;  %1054 = vadd.xlane.f32.xlu1 %v2403_v10 }
 0x255   : > { %v922_v59 = vpop.permute.xlu1 %921  ;;  %v2405_v12 = vpop.eup %2404 }
 0x256   : > { %2410 = vpow2.f32 %v998_v28  ;;  %v979_v29 = vsub.f32 %v2754_v34, %v922_v59  ;;  %v1232_v20 = vpack.c.bf16 %v2405_v12, %v2401_v7 }
 0x257   : > { %v942_v11 = vpop.permute.xlu0 %941 }
 0x258   : > { %v1000_v1 = vmul.f32 1.442695, %v979_v29  ;;  %1060 = vadd.xlane.f32.xlu1 %v2405_v12  ;;  %v983_v30 = vsub.f32 %v2766_v38, %v942_v11 }
 0x259   : > { %v2407_v6 = vpop.eup %2406  ;;  %v932_v16 = vpop.permute.xlu1 %931 }
 0x25a   : > { %2412 = vpow2.f32 %v1000_v1  ;;  %v981_v17 = vsub.f32 %v2751_v32, %v932_v16  ;;  %1056 = vadd.xlane.f32.xlu0 %v2407_v6  ;;  %v1231_v31 = vpack.c.bf16 %v2407_v6, %v2403_v10  ;;  %v1008_v13 = vmul.f32 1.442695, %v983_v30 }
 0x25b   : > { %v952_v15 = vpop.permute.xlu0 %951 }
 0x25c   : > { %v1004_v21 = vmul.f32 1.442695, %v981_v17  ;;  %2234 = vmatprep.mubr.bf16.mxu1 %v1231_v31  ;;  %v985_v34 = vsub.f32 %v2763_v37, %v952_v15  ;;  %v890_v17 = vmul.f32 1.442695, %v860_v44  ;;  %v892_v31 = vmul.f32 1.442695, %v861_v58 }
 0x25d   : > { %2235 = vmatmul.mubr.bf16.vlgmr.msra.gmra.mxu1 %v1232_v20  ;;  %v937_v50 = vpop.permute.xlu1 %936 }
 0x25e   : > { %2414 = vpow2.f32 %v1004_v21  ;;  %v982_v52 = vsub.f32 %v2760_v36, %v937_v50  ;;  %v1012_v32 = vmul.f32 1.442695, %v985_v34 }
 0x25f   : > { %v2409_v54 = vpop.eup %2408  ;;  %v962_v38 = vpop.permute.xlu0 %961  ;;  %2416 = vpow2.f32 %v1008_v13 }
 0x260   : > { %v1006_v55 = vmul.f32 1.442695, %v982_v52  ;;  %1066 = vadd.xlane.f32.xlu0 %v2409_v54  ;;  %v987_v56 = vsub.f32 %v2779_v42, %v962_v38 }
 0x261   : > { %v947_v57 = vpop.permute.xlu1 %946 }
 0x262   : > { %2418 = vpow2.f32 %v1006_v55  ;;  %v984_v61 = vsub.f32 %v2757_v35, %v947_v57  ;;  %v1016_v48 = vmul.f32 1.442695, %v987_v56  ;;  %v1024_v55 = vld [vmem:[#allocation3 + $0x10] sm:$0xff]  ;;  %v1022_v56 = vld [vmem:[#allocation3] sm:$0xff] }
 0x263   : > { %v2411_v62 = vpop.eup %2410  ;;  %v972_v0 = vpop.permute.xlu0 %971  ;;  %2420 = vpow2.f32 %v1012_v32  ;;  %v1040_v57 = vmul.f32 %v2943_v22, %v1024_v55 }
 0x264   : > { %v1010_v37 = vmul.f32 1.442695, %v984_v61  ;;  %1062 = vadd.xlane.f32.xlu0 %v2411_v62  ;;  %v989_v36 = vsub.f32 %v2775_v41, %v972_v0  ;;  %v1038_v0 = vmul.f32 %v2924_v63, %v1022_v56 }
 0x265   : > { %v957_v2 = vpop.permute.xlu1 %956 }
 0x266   : > { %2422 = vpow2.f32 %v1010_v37  ;;  %v986_v3 = vsub.f32 %v2772_v40, %v957_v2  ;;  %v1020_v42 = vmul.f32 1.442695, %v989_v36  ;;  %v1023_v2 = vld [vmem:[#allocation3 + $0x8] sm:$0xff] }
 0x267   : > { %v2413_v5 = vpop.eup %2412  ;;  %2424 = vpow2.f32 %v1016_v48  ;;  %v3001_v21 = vpop.permute.xlu0 %1137  ;;  %v1025_v48 = vld [vmem:[#allocation3 + $0x18] sm:$0xff] }
 0x268   : > { %v1014_v26 = vmul.f32 1.442695, %v986_v3  ;;  %v1233_v4 = vpack.c.bf16 %v2413_v5, %v2411_v62  ;;  %v1041_v3 = vmul.f32 %v2929_v14, %v1025_v48 }
 0x269   : > { %v967_v7 = vpop.permute.xlu1 %966 }
 0x26a   : > { %2426 = vpow2.f32 %v1014_v26  ;;  %v988_v35 = vsub.f32 %v2769_v39, %v967_v7  ;;  %2238 = vmatprep.mubr.bf16.mxu1 %v1233_v4  ;;  %v1039_v4 = vmul.f32 %v2935_v18, %v1023_v2  ;;  %v1028_v7 = vld [vmem:[#allocation3 + $0x30] sm:$0xff]  ;;  %v1029_v18 = vld [vmem:[#allocation3 + $0x38] sm:$0xff] }
 0x26b   : > { %v2415_v9 = vpop.eup %2414  ;;  %2428 = vpow2.f32 %v1020_v42  ;;  %v3005_v60 = vpop.permute.xlu0 %1152  ;;  %v1044_v63 = vmul.f32 %v2955_v24, %v1028_v7 }
 0x26c   : > { %v1018_v27 = vmul.f32 1.442695, %v988_v35  ;;  %1068 = vadd.xlane.f32.xlu1 %v2415_v9  ;;  %v1234_v10 = vpack.c.bf16 %v2415_v9, %v2409_v54  ;;  %v2417_v41 = vpop.eup %2416  ;;  %v1026_v9 = vld [vmem:[#allocation3 + $0x20] sm:$0xff] }
 0x26d   : > { %v3003_v51 = vpop.permute.xlu1 %1142  ;;  %v1042_v14 = vmul.f32 %v2949_v23, %v1026_v9  ;;  %v1122_v9 = vld [vmem:[#allocation4 + $0x18] sm:$0xff] }
 0x26e   : > { %2430 = vpow2.f32 %v1018_v27  ;;  %2239 = vmatmul.mubr.bf16.gmra.mxu1 %v1234_v10 }
 0x26f   : > { %v2419_v28 = vpop.eup %2418  ;;  %2432 = vpow2.f32 %v890_v17  ;;  %v3009_v13 = vpop.permute.xlu0 %1172  ;;  %v1031_v17 = vld [vmem:[#allocation3 + $0x48] sm:$0xff] }
 0x270   : > { %1064 = vadd.xlane.f32.xlu1 %v2413_v5  ;;  %v1235_v40 = vpack.c.bf16 %v2417_v41, %v2419_v28  ;;  %v2421_v59 = vpop.eup %2420  ;;  %2434 = vpow2.f32 %v892_v31  ;;  %v1047_v56 = vmul.f32 %v2958_v33, %v1031_v17 }
 0x271   : > { %v3007_v44 = vpop.permute.xlu1 %1147 }
 0x272   : > { %2242 = vmatprep.mubr.bf16.mxu1 %v1235_v40 }
 0x273   : > { %v2423_v29 = vpop.eup %2422  ;;  %v3013_v53 = vpop.permute.xlu0 %1162 }
 0x274   : > { %1076 = vadd.xlane.f32.xlu1 %v2421_v59  ;;  %1074 = vadd.xlane.f32.xlu0 %v2423_v29  ;;  %v1236_v12 = vpack.c.bf16 %v2421_v59, %v2423_v29  ;;  %v2425_v11 = vpop.eup %2424  ;;  %v1027_v59 = vld [vmem:[#allocation3 + $0x28] sm:$0xff] }
 0x275   : > { %v3011_v45 = vpop.permute.xlu1 %1157  ;;  %v1043_v24 = vmul.f32 %v2946_v8, %v1027_v59 }
 0x276   : > { %2243 = vmatmul.mubr.bf16.gmra.mxu1 %v1236_v12 }
 0x277   : > { %v2427_v39 = vpop.eup %2426  ;;  %v3017_v34 = vpop.permute.xlu0 %1192 }
 0x278   : > { %1072 = vadd.xlane.f32.xlu1 %v2417_v41  ;;  %1070 = vadd.xlane.f32.xlu0 %v2419_v28  ;;  %v1237_v1 = vpack.c.bf16 %v2425_v11, %v2427_v39  ;;  %v2429_v6 = vpop.eup %2428  ;;  %v1045_v28 = vmul.f32 %v2938_v19, %v1029_v18  ;;  %v1030_v19 = vld [vmem:[#allocation3 + $0x40] sm:$0xff] }
 0x279   : > { %v3015_v58 = vpop.permute.xlu1 %1167  ;;  %v1046_v8 = vmul.f32 %v2967_v47, %v1030_v19  ;;  %v1035_v47 = vld [vmem:[#allocation3 + $0x68] sm:$0xff] }
 0x27a   : > { %2246 = vmatprep.mubr.bf16.mxu1 %v1237_v1 }
 0x27b   : > { %v2431_v30 = vpop.eup %2430  ;;  %v3021_v52 = vpop.permute.xlu0 %1182 }
 0x27c   : > { %1084 = vadd.xlane.f32.xlu1 %v2429_v6  ;;  %1082 = vadd.xlane.f32.xlu0 %v2431_v30  ;;  %v1238_v16 = vpack.c.bf16 %v2429_v6, %v2431_v30  ;;  %v2995_v15 = vpop.eup %2432 }
 0x27d   : > { %v2998_v20 = vpop.eup %2434  ;;  %v3019_v50 = vpop.permute.xlu1 %1187 }
 0x27e   : > { %2247 = vmatmul.mubr.bf16.gmra.mxu1 %v1238_v16 }
 0x27f   : > { %v3025_v38 = vpop.permute.xlu0 %1202 }
 0x280   : > { %1080 = vadd.xlane.f32.xlu1 %v2425_v11  ;;  %1078 = vadd.xlane.f32.xlu0 %v2427_v39  ;;  %v1032_v11 = vld [vmem:[#allocation3 + $0x50] sm:$0xff]  ;;  %v1033_v39 = vld [vmem:[#allocation3 + $0x58] sm:$0xff] }
 0x281   : > { %v3023_v54 = vpop.permute.xlu1 %1177  ;;  %v1048_v23 = vmul.f32 %v2961_v43, %v1032_v11  ;;  %v1049_v6 = vmul.f32 %v2952_v25, %v1033_v39  ;;  %v1037_v43 = vld [vmem:[#allocation3 + $0x78] sm:$0xff] }
 0x282   : > { %v1053_v48 = vmul.f32 %v2998_v20, %v1037_v43 }
 0x285   : > { %v3027_v32 = vpop.permute.xlu1 %1197 }
 0x291   : > { %1207 = vperm.xlu1 %2347, %v2995_v15  }
 0x296   : > { %1212 = vperm.xlu0 %2346, %v2998_v20   ;;  %v1121_v20 = vld [vmem:[#allocation4 + $0x10] sm:$0xff] }
 0x2db   : > { %v1059_v61 = vpop.xlane.xlu0 %1058 }
 0x2dc   : > { %v1088_v62 = vadd.f32 %v1059_v61, %v1040_v57 }
 0x2dd   : > { %v1055_v37 = vpop.xlane.xlu1 %1054 }
 0x2de   : > { %1105 = vst.msk [vmem:[#allocation3 + $0x10] sm:$0xff] %vm1102_vm3, %v1088_v62  ;;  %v1086_v36 = vadd.f32 %v1055_v37, %v1038_v0  ;;  %v1036_v62 = vld [vmem:[#allocation3 + $0x70] sm:$0xff] }
 0x2df   : > { %v1052_v37 = vmul.f32 %v2995_v15, %v1036_v62  ;;  %v1128_v62 = vld [vmem:[#allocation4 + $0x48] sm:$0xff] }
 0x2e0   : > { %1103 = vst.msk [vmem:[#allocation3] sm:$0xff] %vm1102_vm3, %v1086_v36 }
 0x2e1   : > { %v1061_v5 = vpop.xlane.xlu1 %1060 }
 0x2e2   : > { %v1089_v26 = vadd.f32 %v1061_v5, %v1041_v3  ;;  %v1034_v3 = vld [vmem:[#allocation3 + $0x60] sm:$0xff] }
 0x2e3   : > { %v1057_v42 = vpop.xlane.xlu0 %1056 }
 0x2e4   : > { %1106 = vst.msk [vmem:[#allocation3 + $0x18] sm:$0xff] %vm1102_vm3, %v1089_v26  ;;  %v1087_v22 = vadd.f32 %v1057_v42, %v1039_v4  ;;  %v1050_v26 = vmul.f32 %v2970_v49, %v1034_v3  ;;  %v1051_v4 = vmul.f32 %v2964_v46, %v1035_v47  ;;  %v1120_v49 = vld [vmem:[#allocation4 + $0x8] sm:$0xff]  ;;  %v1218_v46 = vmul.f32 %v3005_v60, %v1122_v9  ;;  %v1126_v60 = vld [vmem:[#allocation4 + $0x38] sm:$0xff] }
 0x2e6   : > { %1104 = vst.msk [vmem:[#allocation3 + $0x8] sm:$0xff] %vm1102_vm3, %v1087_v22 }
 0x2e9   : > { %v1067_v35 = vpop.xlane.xlu0 %1066 }
 0x2ea   : > { %v1092_v27 = vadd.f32 %v1067_v35, %v1044_v63  ;;  %v1119_v63 = vld [vmem:[#allocation4] sm:$0xff]  ;;  %v1217_v35 = vmul.f32 %v3007_v44, %v1121_v20 }
 0x2ec   : > { %1109 = vst.msk [vmem:[#allocation3 + $0x30] sm:$0xff] %vm1102_vm3, %v1092_v27 }
 0x2ed   : > { %v1063_v10 = vpop.xlane.xlu0 %1062 }
 0x2ee   : > { %v1090_v41 = vadd.f32 %v1063_v10, %v1042_v14  ;;  %v1215_v14 = vmul.f32 %v3001_v21, %v1119_v63  ;;  %v1125_v21 = vld [vmem:[#allocation4 + $0x30] sm:$0xff] }
 0x2f0   : > { %1107 = vst.msk [vmem:[#allocation3 + $0x20] sm:$0xff] %vm1102_vm3, %v1090_v41 }
 0x2f5   : > { %v1069_v40 = vpop.xlane.xlu1 %1068 }
 0x2f6   : > { %v1093_v29 = vadd.f32 %v1069_v40, %v1045_v28  ;;  %v1216_v40 = vmul.f32 %v3003_v51, %v1120_v49 }
 0x2f8   : > { %1110 = vst.msk [vmem:[#allocation3 + $0x38] sm:$0xff] %vm1102_vm3, %v1093_v29 }
 0x2f9   : > { %v1065_v12 = vpop.xlane.xlu1 %1064 }
 0x2fa   : > { %v1091_v1 = vadd.f32 %v1065_v12, %v1043_v24  ;;  %v1123_v24 = vld [vmem:[#allocation4 + $0x20] sm:$0xff]  ;;  %v1221_v12 = vmul.f32 %v3015_v58, %v1125_v21 }
 0x2fb   : > { %v1219_v39 = vmul.f32 %v3011_v45, %v1123_v24  ;;  %v1127_v58 = vld [vmem:[#allocation4 + $0x40] sm:$0xff] }
 0x2fc   : > { %1108 = vst.msk [vmem:[#allocation3 + $0x28] sm:$0xff] %vm1102_vm3, %v1091_v1 }
 0x2fd   : > { %v1075_v30 = vpop.xlane.xlu0 %1074  ;;  %v1077_v16 = vpop.xlane.xlu1 %1076 }
 0x2fe   : > { %v1096_v31 = vadd.f32 %v1075_v30, %v1048_v23  ;;  %v1097_v55 = vadd.f32 %v1077_v16, %v1049_v6  ;;  %v1124_v23 = vld [vmem:[#allocation4 + $0x28] sm:$0xff]  ;;  %v1222_v6 = vmul.f32 %v3009_v13, %v1126_v60  ;;  %v1129_v16 = vld [vmem:[#allocation4 + $0x50] sm:$0xff]  ;;  %v1223_v13 = vmul.f32 %v3023_v54, %v1127_v58 }
 0x2ff   : > { %v1220_v17 = vmul.f32 %v3013_v53, %v1124_v23 }
 0x300   : > { %1113 = vst.msk [vmem:[#allocation3 + $0x50] sm:$0xff] %vm1102_vm3, %v1096_v31  ;;  %1114 = vst.msk [vmem:[#allocation3 + $0x58] sm:$0xff] %vm1102_vm3, %v1097_v55 }
 0x301   : > { %v1071_v57 = vpop.xlane.xlu0 %1070  ;;  %v1073_v61 = vpop.xlane.xlu1 %1072 }
 0x302   : > { %v1094_v0 = vadd.f32 %v1071_v57, %v1046_v8  ;;  %v1095_v25 = vadd.f32 %v1073_v61, %v1047_v56  ;;  %v1225_v8 = vmul.f32 %v3019_v50, %v1129_v16  ;;  %v1130_v56 = vld [vmem:[#allocation4 + $0x58] sm:$0xff] }
 0x303   : > { %v1226_v53 = vmul.f32 %v3017_v34, %v1130_v56 }
 0x304   : > { %1111 = vst.msk [vmem:[#allocation3 + $0x40] sm:$0xff] %vm1102_vm3, %v1094_v0  ;;  %1112 = vst.msk [vmem:[#allocation3 + $0x48] sm:$0xff] %vm1102_vm3, %v1095_v25  ;;  %v1133_v25 = vld [vmem:[#allocation4 + $0x70] sm:$0xff] }
 0x305   : > { %v1083_v36 = vpop.xlane.xlu0 %1082  ;;  %v1085_v2 = vpop.xlane.xlu1 %1084 }
 0x306   : > { %v1100_v5 = vadd.f32 %v1083_v36, %v1052_v37  ;;  %v1101_v33 = vadd.f32 %v1085_v2, %v1053_v48  ;;  %v1224_v48 = vmul.f32 %v3021_v52, %v1128_v62  ;;  %v1131_v2 = vld [vmem:[#allocation4 + $0x60] sm:$0xff] }
 0x308   : > { %1117 = vst.msk [vmem:[#allocation3 + $0x70] sm:$0xff] %vm1102_vm3, %v1100_v5  ;;  %1118 = vst.msk [vmem:[#allocation3 + $0x78] sm:$0xff] %vm1102_vm3, %v1101_v33  ;;  %v1134_v5 = vld [vmem:[#allocation4 + $0x78] sm:$0xff] }
 0x309   : > { %v1079_v42 = vpop.xlane.xlu0 %1078  ;;  %v1081_v22 = vpop.xlane.xlu1 %1080 }
 0x30a   : > { %v1098_v7 = vadd.f32 %v1079_v42, %v1050_v26  ;;  %v1099_v15 = vadd.f32 %v1081_v22, %v1051_v4  ;;  %v1227_v26 = vmul.f32 %v3027_v32, %v1131_v2  ;;  %v1132_v42 = vld [vmem:[#allocation4 + $0x68] sm:$0xff] }
 0x30b   : > { %v1228_v20 = vmul.f32 %v3025_v38, %v1132_v42 }
 0x30c   : > { %1115 = vst.msk [vmem:[#allocation3 + $0x60] sm:$0xff] %vm1102_vm3, %v1098_v7  ;;  %1116 = vst.msk [vmem:[#allocation3 + $0x68] sm:$0xff] %vm1102_vm3, %v1099_v15 }
 0x30d   : > { %v1208_v37 = vpop.permute.xlu1 %1207 }
 0x30e   : > { %v1229_v3 = vmul.f32 %v1208_v37, %v1133_v25 }
 0x311   : > { %v1213_v33 = vpop.permute.xlu0 %1212 }
 0x312   : > { %v1230_v52 = vmul.f32 %v1213_v33, %v1134_v5 }
 0x31d   : > { %v2236_v27 = vpop.f32.mrf.mxu1 }
 0x31e   : > { %v1402_v10 = vadd.f32 %v2236_v27, %v1217_v35 }
 0x31f   : > { %v1337_v41 = vpop.f32.mrf.mxu1 }
 0x320   : > { %1418 = vst.msk [vmem:[#allocation4 + $0x10] sm:$0xff] %vm636_vm2, %v1402_v10  ;;  %v1400_v18 = vadd.f32 %v1337_v41, %v1215_v14 }
 0x321   : > { %v2237_v28 = vpop.f32.mrf.mxu1 }
 0x322   : > { %1416 = vst.msk [vmem:[#allocation4] sm:$0xff] %vm636_vm2, %v1400_v18  ;;  %v1403_v59 = vadd.f32 %v2237_v28, %v1218_v46 }
 0x323   : > { %v1340_v29 = vpop.f32.mrf.mxu1 }
 0x324   : > { %1419 = vst.msk [vmem:[#allocation4 + $0x18] sm:$0xff] %vm636_vm2, %v1403_v59  ;;  %v1401_v44 = vadd.f32 %v1340_v29, %v1216_v40 }
 0x326   : > { %1417 = vst.msk [vmem:[#allocation4 + $0x8] sm:$0xff] %vm636_vm2, %v1401_v44 }
 0x32e   : > { %v2240_v11 = vpop.f32.mrf.mxu1 }
 0x32f   : > { %v1406_v1 = vadd.f32 %v2240_v11, %v1221_v12 }
 0x330   : > { %v1353_v51 = vpop.f32.mrf.mxu1 }
 0x331   : > { %1422 = vst.msk [vmem:[#allocation4 + $0x30] sm:$0xff] %vm636_vm2, %v1406_v1  ;;  %v1404_v30 = vadd.f32 %v1353_v51, %v1219_v39 }
 0x332   : > { %v2241_v19 = vpop.f32.mrf.mxu1 }
 0x333   : > { %1420 = vst.msk [vmem:[#allocation4 + $0x20] sm:$0xff] %vm636_vm2, %v1404_v30  ;;  %v1407_v31 = vadd.f32 %v2241_v19, %v1222_v6 }
 0x334   : > { %v1356_v55 = vpop.f32.mrf.mxu1 }
 0x335   : > { %1423 = vst.msk [vmem:[#allocation4 + $0x38] sm:$0xff] %vm636_vm2, %v1407_v31  ;;  %v1405_v45 = vadd.f32 %v1356_v55, %v1220_v17 }
 0x336   : > { %v2244_v57 = vpop.f32.mrf.mxu1 }
 0x337   : > { %1421 = vst.msk [vmem:[#allocation4 + $0x28] sm:$0xff] %vm636_vm2, %v1405_v45  ;;  %v1410_v61 = vadd.f32 %v2244_v57, %v1225_v8 }
 0x338   : > { %v1369_v43 = vpop.f32.mrf.mxu1 }
 0x339   : > { %1426 = vst.msk [vmem:[#allocation4 + $0x50] sm:$0xff] %vm636_vm2, %v1410_v61  ;;  %v1408_v0 = vadd.f32 %v1369_v43, %v1223_v13 }
 0x33a   : > { %v2245_v50 = vpop.f32.mrf.mxu1 }
 0x33b   : > { %1424 = vst.msk [vmem:[#allocation4 + $0x40] sm:$0xff] %vm636_vm2, %v1408_v0  ;;  %v1411_v36 = vadd.f32 %v2245_v50, %v1226_v53 }
 0x33c   : > { %v1372_v54 = vpop.f32.mrf.mxu1 }
 0x33d   : > { %1427 = vst.msk [vmem:[#allocation4 + $0x58] sm:$0xff] %vm636_vm2, %v1411_v36  ;;  %v1409_v47 = vadd.f32 %v1372_v54, %v1224_v48 }
 0x33e   : > { %v2248_v34 = vpop.f32.mrf.mxu1 }
 0x33f   : > { %1425 = vst.msk [vmem:[#allocation4 + $0x48] sm:$0xff] %vm636_vm2, %v1409_v47  ;;  %v1414_v4 = vadd.f32 %v2248_v34, %v1229_v3 }
 0x340   : > { %v1385_v22 = vpop.f32.mrf.mxu1 }
 0x341   : > { %1430 = vst.msk [vmem:[#allocation4 + $0x70] sm:$0xff] %vm636_vm2, %v1414_v4  ;;  %v1412_v7 = vadd.f32 %v1385_v22, %v1227_v26 }
 0x342   : > { %v2249_v15 = vpop.f32.mrf.mxu1 }
 0x343   : > { %1428 = vst.msk [vmem:[#allocation4 + $0x60] sm:$0xff] %vm636_vm2, %v1412_v7  ;;  %v1415_v63 = vadd.f32 %v2249_v15, %v1230_v52  ;;  %1451 = sbr.rel (%p2117_p10) target bundleno = 1214 (0x4be), region = 56 }
 0x344   : > { %v1388_v35 = vpop.f32.mrf.mxu1 }
 0x345   : > { %1431 = vst.msk [vmem:[#allocation4 + $0x78] sm:$0xff] %vm636_vm2, %v1415_v63  ;;  %v1413_v9 = vadd.f32 %v1388_v35, %v1228_v20 }
 0x347   : > { %1429 = vst.msk [vmem:[#allocation4 + $0x68] sm:$0xff] %vm636_vm2, %v1413_v9 }
 0x348   : > { %v1469_v32 = vld [vmem:[#allocation3 + $0x8] sm:$0xff]  ;;  %v1468_v27 = vld [vmem:[#allocation3] sm:$0xff]  ;;  %v2529_v10 = vmov 0   ;;  %v1478_v49 = vld [vmem:[#allocation3 + $0x50] sm:$0xff] }
 0x349   : > { %v1477_v14 = vld [vmem:[#allocation3 + $0x48] sm:$0xff]  ;;  %2437 = vset.pattern.permute.xlu1 %v2529_v10  ;;  %2436 = vset.pattern.permute.xlu0 %v2529_v10  ;;  %2438 = vrcp.f32 %v1469_v32  ;;  %v1476_v38 = vld [vmem:[#allocation3 + $0x40] sm:$0xff]  ;;  %v1470_v41 = vld [vmem:[#allocation3 + $0x10] sm:$0xff] }
 0x34a   : > { %2440 = vrcp.f32 %v1468_v27  ;;  %v1479_v46 = vld [vmem:[#allocation3 + $0x58] sm:$0xff]  ;;  %v1596_v28 = vld [vmem:[%s3222_s5] sm:$0xff]  ;;  %v1481_v24 = vld [vmem:[#allocation3 + $0x68] sm:$0xff] }
 0x34b   : > { %2442 = vrcp.f32 %v1477_v14  ;;  %v1471_v18 = vld [vmem:[#allocation3 + $0x18] sm:$0xff]  ;;  %v1480_v40 = vld [vmem:[#allocation3 + $0x60] sm:$0xff]  ;;  %2250 = vmatprep.subr.mxu0 %v1596_v28  ;;  %2276 = vmatprep.subr.mxu1 %v1596_v28  ;;  %v1473_v60 = vld [vmem:[#allocation3 + $0x28] sm:$0xff] }
 0x34c   : > { %2444 = vrcp.f32 %v1476_v38  ;;  %v1472_v59 = vld [vmem:[#allocation3 + $0x20] sm:$0xff]  ;;  %2251 = vmatpush3.msra.mxu0 %v1596_v28  ;;  %2277 = vmatpush3.msra.mxu1 %v1596_v28  ;;  %v1482_v39 = vld [vmem:[#allocation3 + $0x70] sm:$0xff]  ;;  %v1483_v6 = vld [vmem:[#allocation3 + $0x78] sm:$0xff] }
 0x34d   : > { %2446 = vrcp.f32 %v1478_v49  ;;  %v1474_v23 = vld [vmem:[#allocation3 + $0x30] sm:$0xff]  ;;  %v1475_v16 = vld [vmem:[#allocation3 + $0x38] sm:$0xff]  ;;  %v1453_v57 = vld [vmem:[#allocation4 + $0x8] sm:$0xff] }
 0x34e   : > { %2448 = vrcp.f32 %v1470_v41  ;;  %v1452_v13 = vld [vmem:[#allocation4] sm:$0xff]  ;;  %v1461_v0 = vld [vmem:[#allocation4 + $0x48] sm:$0xff]  ;;  %v1462_v2 = vld [vmem:[#allocation4 + $0x50] sm:$0xff] }
 0x34f   : > { %2450 = vrcp.f32 %v1479_v46  ;;  %v1460_v25 = vld [vmem:[#allocation4 + $0x40] sm:$0xff]  ;;  %v1454_v54 = vld [vmem:[#allocation4 + $0x10] sm:$0xff]  ;;  %v1463_v34 = vld [vmem:[#allocation4 + $0x58] sm:$0xff] }
 0x350   : > { %2452 = vrcp.f32 %v1471_v18  ;;  %v1455_v26 = vld [vmem:[#allocation4 + $0x18] sm:$0xff]  ;;  %v1464_v7 = vld [vmem:[#allocation4 + $0x60] sm:$0xff]  ;;  %v1465_v32 = vld [vmem:[#allocation4 + $0x68] sm:$0xff] }
 0x351   : > { %2454 = vrcp.f32 %v1480_v40  ;;  %v1456_v15 = vld [vmem:[#allocation4 + $0x20] sm:$0xff]  ;;  %v1457_v27 = vld [vmem:[#allocation4 + $0x28] sm:$0xff]  ;;  %v1466_v41 = vld [vmem:[#allocation4 + $0x70] sm:$0xff] }
 0x352   : > { %2456 = vrcp.f32 %v1472_v59  ;;  %v1458_v46 = vld [vmem:[#allocation4 + $0x30] sm:$0xff] }
 0x353   : > { %2458 = vrcp.f32 %v1481_v24 }
 0x354   : > { %2460 = vrcp.f32 %v1473_v60 }
 0x355   : > { %2462 = vrcp.f32 %v1482_v39 }
 0x356   : > { %v2439_v29 = vpop.eup %2438  ;;  %2464 = vrcp.f32 %v1474_v23 }
 0x357   : > { %v2441_v44 = vpop.eup %2440  ;;  %1507 = vperm.xlu1 %2437, %v2439_v29   ;;  %2466 = vrcp.f32 %v1483_v6  ;;  %v1467_v29 = vld [vmem:[#allocation4 + $0x78] sm:$0xff]  ;;  %v1797_v6 = vld [vmem:[%s2623_s22] sm:$0xff] }
 0x358   : > { %v2443_v21 = vpop.eup %2442  ;;  %1502 = vperm.xlu0 %2436, %v2441_v44   ;;  %2468 = vrcp.f32 %v1475_v16  ;;  %v1459_v44 = vld [vmem:[#allocation4 + $0x38] sm:$0xff] }
 0x359   : > { %v2445_v12 = vpop.eup %2444 }
 0x35a   : > { %v2447_v11 = vpop.eup %2446 }
 0x35b   : > { %1547 = vperm.xlu1 %2437, %v2443_v21   ;;  %v2449_v1 = vpop.eup %2448 }
 0x35c   : > { %1542 = vperm.xlu0 %2436, %v2445_v12   ;;  %v2451_v51 = vpop.eup %2450 }
 0x35d   : > { %v2453_v30 = vpop.eup %2452 }
 0x35e   : > { %v2455_v19 = vpop.eup %2454 }
 0x35f   : > { %1552 = vperm.xlu1 %2437, %v2447_v11   ;;  %v2457_v17 = vpop.eup %2456  ;;  %v3114_v11 = vld [vmem:[%s3223_s6] ss:$0 sm:$0xff] }
 0x360   : > { %1512 = vperm.xlu0 %2436, %v2449_v1   ;;  %v2459_v31 = vpop.eup %2458  ;;  %v1798_v1 = vld [vmem:[%s2623_s22 + $0x8] sm:$0xff] }
 0x361   : > { %v2461_v58 = vpop.eup %2460 }
 0x362   : > { %v2463_v55 = vpop.eup %2462 }
 0x363   : > { %1557 = vperm.xlu1 %2437, %v2451_v51   ;;  %v2465_v8 = vpop.eup %2464 }
 0x364   : > { %1517 = vperm.xlu0 %2436, %v2453_v30   ;;  %v2467_v45 = vpop.eup %2466 }
 0x365   : > { %v2469_v56 = vpop.eup %2468 }
 0x367   : > { %1562 = vperm.xlu1 %2437, %v2455_v19   ;;  %v1846_v19 = vld [vmem:[%s2628_s10 + $0x8] sm:$0xff] }
 0x368   : > { %1522 = vperm.xlu0 %2436, %v2457_v17  }
 0x36b   : > { %1567 = vperm.xlu1 %2437, %v2459_v31   ;;  %v1806_v31 = vld [vmem:[%s2623_s22 + $0x48] sm:$0xff] }
 0x36c   : > { %1527 = vperm.xlu0 %2436, %v2461_v58  }
 0x36f   : > { %1572 = vperm.xlu1 %2437, %v2463_v55  }
 0x370   : > { %1532 = vperm.xlu0 %2436, %v2465_v8  }
 0x373   : > { %1577 = vperm.xlu1 %2437, %v2467_v45   ;;  %v1845_v45 = vld [vmem:[%s2628_s10] sm:$0xff] }
 0x374   : > { %1537 = vperm.xlu0 %2436, %v2469_v56  }
 0x3d2   : > { %v1508_v61 = vpop.permute.xlu1 %1507 }
 0x3d3   : > { %v1581_v62 = vmul.f32 %v1508_v61, %v1453_v57  ;;  %v1503_v43 = vpop.permute.xlu0 %1502  ;;  %v1805_v57 = vld [vmem:[%s2623_s22 + $0x40] sm:$0xff] }
 0x3d4   : > { %v1580_v53 = vmul.f32 %v1503_v43, %v1452_v13 }
 0x3d6   : > { %2252 = vmatprep.mubr.msk.f32.mxu0 %vm636_vm2, %v1580_v53  ;;  %v1548_v37 = vpop.permute.xlu1 %1547  ;;  %v1854_v53 = vld [vmem:[%s2628_s10 + $0x48] sm:$0xff] }
 0x3d7   : > { %v1589_v50 = vmul.f32 %v1548_v37, %v1461_v0  ;;  %v1543_v48 = vpop.permute.xlu0 %1542  ;;  %2253 = vmatmul.mubr.msk.f32.vlgmr.msra.gmra.mxu0 %vm636_vm2, %v1581_v62 }
 0x3d8   : > { %v1588_v36 = vmul.f32 %v1543_v48, %v1460_v25 }
 0x3da   : > { %2264 = vmatprep.mubr.msk.f32.mxu1 %vm636_vm2, %v1588_v36  ;;  %v1553_v3 = vpop.permute.xlu1 %1552  ;;  %v1808_v36 = vld [vmem:[%s2623_s22 + $0x58] sm:$0xff] }
 0x3db   : > { %v1590_v47 = vmul.f32 %v1553_v3, %v1462_v2  ;;  %v1513_v5 = vpop.permute.xlu0 %1512  ;;  %2265 = vmatmul.mubr.msk.f32.vlgmr.msra.gmra.mxu1 %vm636_vm2, %v1589_v50  ;;  %v1853_v50 = vld [vmem:[%s2628_s10 + $0x40] sm:$0xff] }
 0x3dc   : > { %v1582_v33 = vmul.f32 %v1513_v5, %v1454_v54 }
 0x3dd   : > { %2267 = vmatprep.mubr.msk.f32.mxu1 %vm636_vm2, %v1590_v47  ;;  %v1800_v47 = vld [vmem:[%s2623_s22 + $0x18] sm:$0xff] }
 0x3de   : > { %2255 = vmatprep.mubr.msk.f32.mxu0 %vm636_vm2, %v1582_v33  ;;  %v1558_v4 = vpop.permute.xlu1 %1557 }
 0x3df   : > { %v1591_v42 = vmul.f32 %v1558_v4, %v1463_v34  ;;  %v1518_v22 = vpop.permute.xlu0 %1517 }
 0x3e0   : > { %v1583_v52 = vmul.f32 %v1518_v22, %v1455_v26  ;;  %v1807_v26 = vld [vmem:[%s2623_s22 + $0x50] sm:$0xff] }
 0x3e1   : > { %2268 = vmatmul.mubr.msk.f32.gmra.mxu1 %vm636_vm2, %v1591_v42 }
 0x3e2   : > { %2256 = vmatmul.mubr.msk.f32.gmra.mxu0 %vm636_vm2, %v1583_v52  ;;  %v1563_v20 = vpop.permute.xlu1 %1562  ;;  %v1799_v52 = vld [vmem:[%s2623_s22 + $0x10] sm:$0xff] }
 0x3e3   : > { %v1592_v63 = vmul.f32 %v1563_v20, %v1464_v7  ;;  %v1523_v35 = vpop.permute.xlu0 %1522  ;;  %v1856_v20 = vld [vmem:[%s2628_s10 + $0x58] sm:$0xff] }
 0x3e4   : > { %v1584_v9 = vmul.f32 %v1523_v35, %v1456_v15  ;;  %v1848_v35 = vld [vmem:[%s2628_s10 + $0x18] sm:$0xff] }
 0x3e5   : > { %2270 = vmatprep.mubr.msk.f32.mxu1 %vm636_vm2, %v1592_v63 }
 0x3e6   : > { %2258 = vmatprep.mubr.msk.f32.mxu0 %vm636_vm2, %v1584_v9  ;;  %v1568_v14 = vpop.permute.xlu1 %1567 }
 0x3e7   : > { %v1593_v10 = vmul.f32 %v1568_v14, %v1465_v32  ;;  %v1528_v38 = vpop.permute.xlu0 %1527 }
 0x3e8   : > { %v1585_v49 = vmul.f32 %v1528_v38, %v1457_v27 }
 0x3e9   : > { %2271 = vmatmul.mubr.msk.f32.gmra.mxu1 %vm636_vm2, %v1593_v10  ;;  %v1855_v10 = vld [vmem:[%s2628_s10 + $0x50] sm:$0xff] }
 0x3ea   : > { %2259 = vmatmul.mubr.msk.f32.gmra.mxu0 %vm636_vm2, %v1585_v49  ;;  %v1573_v18 = vpop.permute.xlu1 %1572  ;;  %v1847_v49 = vld [vmem:[%s2628_s10 + $0x10] sm:$0xff] }
 0x3eb   : > { %v1594_v28 = vmul.f32 %v1573_v18, %v1466_v41  ;;  %v1533_v40 = vpop.permute.xlu0 %1532 }
 0x3ec   : > { %v1586_v59 = vmul.f32 %v1533_v40, %v1458_v46  ;;  %v1810_v40 = vld [vmem:[%s2623_s22 + $0x68] sm:$0xff] }
 0x3ed   : > { %2273 = vmatprep.mubr.msk.f32.mxu1 %vm636_vm2, %v1594_v28 }
 0x3ee   : > { %2261 = vmatprep.mubr.msk.f32.mxu0 %vm636_vm2, %v1586_v59  ;;  %v1578_v21 = vpop.permute.xlu1 %1577 }
 0x3ef   : > { %v1595_v24 = vmul.f32 %v1578_v21, %v1467_v29  ;;  %v1538_v12 = vpop.permute.xlu0 %1537 }
 0x3f0   : > { %v1587_v60 = vmul.f32 %v1538_v12, %v1459_v44  ;;  %v1802_v44 = vld [vmem:[%s2623_s22 + $0x28] sm:$0xff] }
 0x3f1   : > { %2274 = vmatmul.mubr.msk.f32.gmra.mxu1 %vm636_vm2, %v1595_v24 }
 0x3f2   : > { %2262 = vmatmul.mubr.msk.f32.gmra.mxu0 %vm636_vm2, %v1587_v60 }
 0x497   : > { %v2254_v39 = vpop.f32.mrf.mxu0 }
 0x498   : > { %v1724_v23 = vadd.f32 %v2254_v39, %v3114_v11  ;;  %v1809_v39 = vld [vmem:[%s2623_s22 + $0x60] sm:$0xff] }
 0x499   : > { %v1718_v51 = vpop.f32.mrf.mxu0 }
 0x49a   : > { %v1814_v30 = vadd.f32 %v1798_v1, %v1724_v23  ;;  %v1719_v16 = vadd.f32 %v3114_v11, %v1718_v51  ;;  %v1801_v51 = vld [vmem:[%s2623_s22 + $0x20] sm:$0xff] }
 0x49b   : > { %v2266_v17 = vpop.f32.mrf.mxu1 }
 0x49c   : > { %v1830_v58 = vmax.f32 %v1814_v30, 0.0  ;;  %v1813_v55 = vadd.f32 %v1797_v6, %v1719_v16  ;;  %v1764_v8 = vadd.f32 %v2266_v17, %v3114_v11  ;;  %v1858_v16 = vld [vmem:[%s2628_s10 + $0x68] sm:$0xff] }
 0x49d   : > { %v1758_v56 = vpop.f32.mrf.mxu1  ;;  %v1850_v17 = vld [vmem:[%s2628_s10 + $0x28] sm:$0xff] }
 0x49e   : > { %v1862_v13 = vadd.f32 %v1846_v19, %v1830_v58  ;;  %v1829_v61 = vmax.f32 %v1813_v55, 0.0  ;;  %v1822_v62 = vadd.f32 %v1806_v31, %v1764_v8  ;;  %v1759_v43 = vadd.f32 %v3114_v11, %v1758_v56 }
 0x4a0   : > { %1878 = vst.msk [vmem:[%s2633_s14 + $0x8] sm:$0xff] %vm636_vm2, %v1862_v13  ;;  %v1861_v0 = vadd.f32 %v1845_v45, %v1829_v61  ;;  %v1838_v25 = vmax.f32 %v1822_v62, 0.0  ;;  %v1821_v37 = vadd.f32 %v1805_v57, %v1759_v43  ;;  %v1857_v45 = vld [vmem:[%s2628_s10 + $0x60] sm:$0xff] }
 0x4a1   : > { %v2269_v48 = vpop.f32.mrf.mxu1  ;;  %v1849_v57 = vld [vmem:[%s2628_s10 + $0x20] sm:$0xff] }
 0x4a2   : > { %1877 = vst.msk [vmem:[%s2633_s14] sm:$0xff] %vm636_vm2, %v1861_v0  ;;  %v1870_v2 = vadd.f32 %v1854_v53, %v1838_v25  ;;  %v1837_v54 = vmax.f32 %v1821_v37, 0.0  ;;  %v2257_v3 = vpop.f32.mrf.mxu0  ;;  %v1774_v5 = vadd.f32 %v2269_v48, %v3114_v11  ;;  %v1812_v53 = vld [vmem:[%s2623_s22 + $0x78] sm:$0xff] }
 0x4a3   : > { %v1734_v33 = vadd.f32 %v2257_v3, %v3114_v11  ;;  %v1768_v34 = vpop.f32.mrf.mxu1  ;;  %v1804_v37 = vld [vmem:[%s2623_s22 + $0x38] sm:$0xff] }
 0x4a4   : > { %1886 = vst.msk [vmem:[%s2633_s14 + $0x48] sm:$0xff] %vm636_vm2, %v1870_v2  ;;  %v1869_v4 = vadd.f32 %v1853_v50, %v1837_v54  ;;  %v1824_v42 = vadd.f32 %v1808_v36, %v1774_v5  ;;  %v1728_v22 = vpop.f32.mrf.mxu0  ;;  %v1769_v7 = vadd.f32 %v3114_v11, %v1768_v34  ;;  %v1811_v54 = vld [vmem:[%s2623_s22 + $0x70] sm:$0xff] }
 0x4a5   : > { %v1816_v15 = vadd.f32 %v1800_v47, %v1734_v33  ;;  %v1729_v63 = vadd.f32 %v3114_v11, %v1728_v22  ;;  %v1803_v5 = vld [vmem:[%s2623_s22 + $0x30] sm:$0xff] }
 0x4a6   : > { %1885 = vst.msk [vmem:[%s2633_s14 + $0x40] sm:$0xff] %vm636_vm2, %v1869_v4  ;;  %v1840_v9 = vmax.f32 %v1824_v42, 0.0  ;;  %v1823_v32 = vadd.f32 %v1807_v26, %v1769_v7  ;;  %v1860_v26 = vld [vmem:[%s2628_s10 + $0x78] sm:$0xff] }
 0x4a7   : > { %v1832_v27 = vmax.f32 %v1816_v15, 0.0  ;;  %v1815_v14 = vadd.f32 %v1799_v52, %v1729_v63  ;;  %v1852_v42 = vld [vmem:[%s2628_s10 + $0x38] sm:$0xff] }
 0x4a8   : > { %v1872_v38 = vadd.f32 %v1856_v20, %v1840_v9  ;;  %v1839_v41 = vmax.f32 %v1823_v32, 0.0  ;;  %v1859_v20 = vld [vmem:[%s2628_s10 + $0x70] sm:$0xff] }
 0x4a9   : > { %v1864_v46 = vadd.f32 %v1848_v35, %v1832_v27  ;;  %v1831_v18 = vmax.f32 %v1815_v14, 0.0  ;;  %v2272_v28 = vpop.f32.mrf.mxu1  ;;  %v1851_v35 = vld [vmem:[%s2628_s10 + $0x30] sm:$0xff] }
 0x4aa   : > { %1888 = vst.msk [vmem:[%s2633_s14 + $0x58] sm:$0xff] %vm636_vm2, %v1872_v38  ;;  %v1871_v59 = vadd.f32 %v1855_v10, %v1839_v41  ;;  %v2260_v29 = vpop.f32.mrf.mxu0  ;;  %v1784_v21 = vadd.f32 %v2272_v28, %v3114_v11 }
 0x4ab   : > { %1880 = vst.msk [vmem:[%s2633_s14 + $0x18] sm:$0xff] %vm636_vm2, %v1864_v46  ;;  %v1863_v24 = vadd.f32 %v1847_v49, %v1831_v18  ;;  %v1744_v12 = vadd.f32 %v2260_v29, %v3114_v11  ;;  %v1778_v60 = vpop.f32.mrf.mxu1 }
 0x4ac   : > { %1887 = vst.msk [vmem:[%s2633_s14 + $0x50] sm:$0xff] %vm636_vm2, %v1871_v59  ;;  %v1826_v1 = vadd.f32 %v1810_v40, %v1784_v21  ;;  %v1738_v23 = vpop.f32.mrf.mxu0  ;;  %v1779_v6 = vadd.f32 %v3114_v11, %v1778_v60 }
 0x4ad   : > { %1879 = vst.msk [vmem:[%s2633_s14 + $0x10] sm:$0xff] %vm636_vm2, %v1863_v24  ;;  %v1818_v30 = vadd.f32 %v1802_v44, %v1744_v12  ;;  %v1739_v19 = vadd.f32 %v3114_v11, %v1738_v23 }
 0x4ae   : > { %v1842_v31 = vmax.f32 %v1826_v1, 0.0  ;;  %v1825_v58 = vadd.f32 %v1809_v39, %v1779_v6 }
 0x4af   : > { %v1834_v55 = vmax.f32 %v1818_v30, 0.0  ;;  %v1817_v8 = vadd.f32 %v1801_v51, %v1739_v19 }
 0x4b0   : > { %v1874_v56 = vadd.f32 %v1858_v16, %v1842_v31  ;;  %v1841_v13 = vmax.f32 %v1825_v58, 0.0 }
 0x4b1   : > { %v1866_v61 = vadd.f32 %v1850_v17, %v1834_v55  ;;  %v1833_v62 = vmax.f32 %v1817_v8, 0.0  ;;  %v2275_v43 = vpop.f32.mrf.mxu1 }
 0x4b2   : > { %1890 = vst.msk [vmem:[%s2633_s14 + $0x68] sm:$0xff] %vm636_vm2, %v1874_v56  ;;  %v1873_v0 = vadd.f32 %v1857_v45, %v1841_v13  ;;  %v2263_v25 = vpop.f32.mrf.mxu0  ;;  %v1794_v50 = vadd.f32 %v2275_v43, %v3114_v11 }
 0x4b3   : > { %1882 = vst.msk [vmem:[%s2633_s14 + $0x28] sm:$0xff] %vm636_vm2, %v1866_v61  ;;  %v1865_v48 = vadd.f32 %v1849_v57, %v1833_v62  ;;  %v1754_v36 = vadd.f32 %v2263_v25, %v3114_v11  ;;  %v1788_v2 = vpop.f32.mrf.mxu1 }
 0x4b4   : > { %1889 = vst.msk [vmem:[%s2633_s14 + $0x60] sm:$0xff] %vm636_vm2, %v1873_v0  ;;  %v1828_v3 = vadd.f32 %v1812_v53, %v1794_v50  ;;  %v1748_v47 = vpop.f32.mrf.mxu0  ;;  %v1789_v33 = vadd.f32 %v3114_v11, %v1788_v2 }
 0x4b5   : > { %1881 = vst.msk [vmem:[%s2633_s14 + $0x20] sm:$0xff] %vm636_vm2, %v1865_v48  ;;  %v1820_v34 = vadd.f32 %v1804_v37, %v1754_v36  ;;  %v1749_v4 = vadd.f32 %v3114_v11, %v1748_v47 }
 0x4b6   : > { %v1844_v22 = vmax.f32 %v1828_v3, 0.0  ;;  %v1827_v52 = vadd.f32 %v1811_v54, %v1789_v33 }
 0x4b7   : > { %v1836_v7 = vmax.f32 %v1820_v34, 0.0  ;;  %v1819_v15 = vadd.f32 %v1803_v5, %v1749_v4 }
 0x4b8   : > { %v1876_v63 = vadd.f32 %v1860_v26, %v1844_v22  ;;  %v1843_v9 = vmax.f32 %v1827_v52, 0.0 }
 0x4b9   : > { %v1868_v32 = vadd.f32 %v1852_v42, %v1836_v7  ;;  %v1835_v27 = vmax.f32 %v1819_v15, 0.0 }
 0x4ba   : > { %1892 = vst.msk [vmem:[%s2633_s14 + $0x78] sm:$0xff] %vm636_vm2, %v1876_v63  ;;  %v1875_v14 = vadd.f32 %v1859_v20, %v1843_v9 }
 0x4bb   : > { %1884 = vst.msk [vmem:[%s2633_s14 + $0x38] sm:$0xff] %vm636_vm2, %v1868_v32  ;;  %v1867_v10 = vadd.f32 %v1851_v35, %v1835_v27 }
 0x4bc   : > { %1891 = vst.msk [vmem:[%s2633_s14 + $0x70] sm:$0xff] %vm636_vm2, %v1875_v14 }
 0x4bd   : > { %1883 = vst.msk [vmem:[%s2633_s14 + $0x30] sm:$0xff] %vm636_vm2, %v1867_v10 }
 0x4be PF: > { %s17_s30 = sadd.s32 1, %s2524_s30   ;;  %s3231_s10 = sld [smem:[#allocation5_spill]] }
 0x4bf   : > { %p14_p11 = scmp.ge.s32.totalorder %s17_s30, 10   ;;  %s3232_s12 = sld [smem:[#allocation6_spill]] }
 0x4c0   : > { %s3233_s24 = smov %s2512_s27  ;;  %s3234_s25 = smov %s2516_s28 }
 0x4c1   : > { %s3235_s26 = smov %s2520_s29  ;;  %s3236_s27 = smov %s3240_s8 }
 0x4c2   :  { %16 = sbr.rel (!%p14_p11) target bundleno = 5 (0x5), region = 98 }
 0x4c4   : > { %s3237_s28 = smov %s3231_s10 }
 0x4c5   : > { %s3238_s29 = smov %s3232_s12 }

</bundles_post_ra>
